<compile_context>
chip_gen: v6e
topology: v6e:2x2x1
jax: 0.10.0
libtpu: 0.0.40
codegen_flags: <defaults>
</compile_context>

<pallas_src>
import jax
import jax.numpy as jnp
from jax import lax
from jax.experimental import pallas as pl
from jax.experimental.pallas import tpu as pltpu

EPS = 1e-5
LANES = 128


def _fused_kernel(x_ref, w_ref, g_ref, b_ref, o_ref, s1_ref, s2_ref):
    # x_ref : (N, H+2, W+2, Cp)  spatially zero-padded, channel-padded input
    # w_ref : (9, Cp)            depthwise taps, row index = 3*dy + dx
    # g_ref : (1, Cp) gamma      b_ref : (1, Cp) beta
    # o_ref : (N, H, W, Cp)      output (also holds the raw conv result)
    # s1_ref, s2_ref : (1, Cp)   per-channel sum / sum-of-squares scratch
    N, Hp, Wp, Cp = x_ref.shape
    H, W = Hp - 2, Wp - 2
    inv_cnt = 1.0 / float(N * H * W)

    s1_ref[...] = jnp.zeros_like(s1_ref)
    s2_ref[...] = jnp.zeros_like(s2_ref)

    # ---- Pass 1: ReLU + depthwise 3x3 conv, fused BN statistics -------------
    @pl.loop(0, N)
    def _(n):
        xp = jnp.maximum(x_ref[n], 0.0)            # ReLU; zero pad is preserved
        acc = jnp.zeros((H, W, Cp), jnp.float32)
        for dx in range(3):                        # 3 W-offset slices (not 9)
            xs = xp[:, dx:dx + W, :]               # (Hp, W, Cp)
            for dy in range(3):                    # leading-dim slices: free
                acc = acc + xs[dy:dy + H] * w_ref[3 * dy + dx]
        o_ref[n] = acc                             # lane-dense store (Cp=128)
        s1_ref[...] += jnp.sum(acc, axis=(0, 1))
        s2_ref[...] += jnp.sum(acc * acc, axis=(0, 1))

    # ---- BN (training mode): biased variance, folded into scale/shift -------
    mean = s1_ref[...] * inv_cnt                               # (1, Cp)
    var = jnp.maximum(s2_ref[...] * inv_cnt - mean * mean, 0.0)
    inv = lax.rsqrt(var + EPS)
    scale = inv * g_ref[...]
    shift = b_ref[...] - mean * scale

    # ---- Pass 2: normalize in place (single FMA per element) ----------------
    @pl.loop(0, N)
    def _(n):
        o_ref[n] = o_ref[n] * scale + shift


def _fused_relu_dwconv_bn_impl(x_nchw, w_oihw, gamma, beta):
    """x_nchw: (N, C, H, W) f32; w_oihw: (C, 1, 3, 3); gamma/beta: (C,)."""
    N, C, H, W = x_nchw.shape
    Cp = ((C + LANES - 1) // LANES) * LANES        # lane-dense channel count

    # NCHW -> NHWC + spatial pad (conv pad=1) + channel lane-pad, one fused pass.
    x_nhwc = jnp.transpose(x_nchw.astype(jnp.float32), (0, 2, 3, 1))
    x_prep = jnp.pad(x_nhwc, ((0, 0), (1, 1), (1, 1), (0, Cp - C)))

    # (C,1,3,3) -> (9, Cp): one small tile, plain row reads in the kernel.
    w9 = jnp.transpose(w_oihw[:, 0].reshape(C, 9).astype(jnp.float32))
    w9 = jnp.pad(w9, ((0, 0), (0, Cp - C)))
    g = jnp.pad(gamma.astype(jnp.float32).reshape(1, C),
                ((0, 0), (0, Cp - C)), constant_values=1.0)
    b = jnp.pad(beta.astype(jnp.float32).reshape(1, C), ((0, 0), (0, Cp - C)))

    out_nhwc = pl.pallas_call(
        _fused_kernel,
        out_shape=jax.ShapeDtypeStruct((N, H, W, Cp), jnp.float32),
        in_specs=[pl.BlockSpec(memory_space=pltpu.MemorySpace.VMEM)] * 4,
        out_specs=pl.BlockSpec(memory_space=pltpu.MemorySpace.VMEM),
        scratch_shapes=[pltpu.VMEM((1, Cp), jnp.float32),
                        pltpu.VMEM((1, Cp), jnp.float32)],
    )(x_prep, w9, g, b)

    # Drop lane padding, back to NCHW (PyTorch convention).
    return jnp.transpose(out_nhwc[..., :C], (0, 3, 1, 2))


fused_relu_dwconv_bn = jax.jit(_fused_relu_dwconv_bn_impl)


def _reference(x_nchw, w_oihw, gamma, beta):
    """Pure-JAX reference (XLA conv) for validation."""
    xr = jnp.maximum(x_nchw, 0.0)
    y = lax.conv_general_dilated(
        xr, w_oihw, window_strides=(1, 1), padding=((1, 1), (1, 1)),
        dimension_numbers=("NCHW", "OIHW", "NCHW"),
        feature_group_count=x_nchw.shape[1],
        precision=lax.Precision.HIGHEST)
    mean = jnp.mean(y, axis=(0, 2, 3), keepdims=True)
    var = jnp.mean((y - mean) ** 2, axis=(0, 2, 3), keepdims=True)
    return (y - mean) * lax.rsqrt(var + EPS) * gamma.reshape(1, -1, 1, 1) \
        + beta.reshape(1, -1, 1, 1)


if __name__ == "__main__":
    # Channels fixed at 116 by the depthwise conv definition; batch=2, 14x14.
    N, C, H, W = 2, 116, 14, 14
    key = jax.random.PRNGKey(0)
    kx, kw, kg, kb = jax.random.split(key, 4)

    x = jax.random.normal(kx, (N, C, H, W), dtype=jnp.float32)
    w = jax.random.normal(kw, (C, 1, 3, 3), dtype=jnp.float32) * 0.1
    gamma = 1.0 + 0.1 * jax.random.normal(kg, (C,), dtype=jnp.float32)
    beta = 0.1 * jax.random.normal(kb, (C,), dtype=jnp.float32)

    out = jax.block_until_ready(fused_relu_dwconv_bn(x, w, gamma, beta))
    ref = jax.block_until_ready(_reference(x, w, gamma, beta))

    assert out.shape == (N, C, H, W)
    assert jnp.allclose(out, ref, atol=1e-4, rtol=1e-4), "mismatch vs reference"
    print("KERNEL_OK")
</pallas_src>

<mosaic_0001>
module attributes {stable_mosaic.version = 11 : i64} {
  func.func @_fused_kernel(%arg0: memref<2x16x16x128xf32, #tpu.memory_space<vmem>>, %arg1: memref<9x128xf32, #tpu.memory_space<vmem>>, %arg2: memref<1x128xf32, #tpu.memory_space<vmem>>, %arg3: memref<1x128xf32, #tpu.memory_space<vmem>>, %arg4: memref<2x14x14x128xf32, #tpu.memory_space<vmem>>, %arg5: memref<1x128xf32, #tpu.memory_space<vmem>>, %arg6: memref<1x128xf32, #tpu.memory_space<vmem>>) attributes {dimension_semantics = [], scalar_prefetch = 0 : i64, scratch_operands = 2 : i64, tpu.core_type = #tpu.core_type<tc>} {
    %cst = arith.constant 0.000000e+00 : f32
    %0 = vector.broadcast %cst : f32 to vector<1x128xf32>
    %c0 = arith.constant 0 : index
    %c0_0 = arith.constant 0 : index
    %1 = vector.load %arg5[%c0, %c0_0] : memref<1x128xf32, #tpu.memory_space<vmem>>, vector<1x128xf32>
    tpu.vector_store %arg5[%c0, %c0_0], %0 {strides = array<i32>} : memref<1x128xf32, #tpu.memory_space<vmem>>, vector<1x128xf32>,
    %cst_1 = arith.constant 0.000000e+00 : f32
    %2 = vector.broadcast %cst_1 : f32 to vector<1x128xf32>
    %c0_2 = arith.constant 0 : index
    %c0_3 = arith.constant 0 : index
    %3 = vector.load %arg6[%c0_2, %c0_3] : memref<1x128xf32, #tpu.memory_space<vmem>>, vector<1x128xf32>
    tpu.vector_store %arg6[%c0_2, %c0_3], %2 {strides = array<i32>} : memref<1x128xf32, #tpu.memory_space<vmem>>, vector<1x128xf32>,
    %c0_i32 = arith.constant 0 : i32
    %c2_i32 = arith.constant 2 : i32
    %4 = arith.addi %c0_i32, %c2_i32 : i32
    %c1_i32 = arith.constant 1 : i32
    scf.for %arg7 = %c0_i32 to %4 step %c1_i32  : i32 {
      %c1_i32_21 = arith.constant 1 : i32
      %24 = arith.muli %arg7, %c1_i32_21 : i32
      %c0_i32_22 = arith.constant 0 : i32
      %25 = arith.addi %c0_i32_22, %24 : i32
      %26 = arith.index_cast %25 : i32 to index
      %c0_23 = arith.constant 0 : index
      %c0_24 = arith.constant 0 : index
      %c0_25 = arith.constant 0 : index
      %27 = vector.load %arg0[%26, %c0_23, %c0_24, %c0_25] : memref<2x16x16x128xf32, #tpu.memory_space<vmem>>, vector<1x16x16x128xf32>
      %28 = vector.shape_cast %27 : vector<1x16x16x128xf32> to vector<16x16x128xf32>
      %cst_26 = arith.constant 0.000000e+00 : f32
      %29 = vector.broadcast %cst_26 : f32 to vector<16x16x128xf32>
      %30 = arith.maximumf %28, %29 : vector<16x16x128xf32>
      %cst_27 = arith.constant 0.000000e+00 : f32
      %31 = vector.broadcast %cst_27 : f32 to vector<14x14x128xf32>
      %32 = vector.extract_strided_slice %30 {offsets = [0, 0, 0], sizes = [16, 14, 128], strides = [1, 1, 1]} : vector<16x16x128xf32> to vector<16x14x128xf32>
      %33 = vector.extract_strided_slice %32 {offsets = [0, 0, 0], sizes = [14, 14, 128], strides = [1, 1, 1]} : vector<16x14x128xf32> to vector<14x14x128xf32>
      %c0_28 = arith.constant 0 : index
      %c0_29 = arith.constant 0 : index
      %34 = vector.load %arg1[%c0_28, %c0_29] : memref<9x128xf32, #tpu.memory_space<vmem>>, vector<1x128xf32>
      %35 = vector.shape_cast %34 : vector<1x128xf32> to vector<128xf32>
      %36 = vector.shape_cast %35 : vector<128xf32> to vector<1x1x128xf32>
      %37 = vector.broadcast %36 : vector<1x1x128xf32> to vector<14x14x128xf32>
      %38 = arith.mulf %33, %37 : vector<14x14x128xf32>
      %39 = arith.addf %31, %38 : vector<14x14x128xf32>
      %40 = vector.extract_strided_slice %32 {offsets = [1, 0, 0], sizes = [14, 14, 128], strides = [1, 1, 1]} : vector<16x14x128xf32> to vector<14x14x128xf32>
      %c3 = arith.constant 3 : index
      %c0_30 = arith.constant 0 : index
      %41 = vector.load %arg1[%c3, %c0_30] : memref<9x128xf32, #tpu.memory_space<vmem>>, vector<1x128xf32>
      %42 = vector.shape_cast %41 : vector<1x128xf32> to vector<128xf32>
      %43 = vector.shape_cast %42 : vector<128xf32> to vector<1x1x128xf32>
      %44 = vector.broadcast %43 : vector<1x1x128xf32> to vector<14x14x128xf32>
      %45 = arith.mulf %40, %44 : vector<14x14x128xf32>
      %46 = arith.addf %39, %45 : vector<14x14x128xf32>
      %47 = vector.extract_strided_slice %32 {offsets = [2, 0, 0], sizes = [14, 14, 128], strides = [1, 1, 1]} : vector<16x14x128xf32> to vector<14x14x128xf32>
      %c6 = arith.constant 6 : index
      %c0_31 = arith.constant 0 : index
      %48 = vector.load %arg1[%c6, %c0_31] : memref<9x128xf32, #tpu.memory_space<vmem>>, vector<1x128xf32>
      %49 = vector.shape_cast %48 : vector<1x128xf32> to vector<128xf32>
      %50 = vector.shape_cast %49 : vector<128xf32> to vector<1x1x128xf32>
      %51 = vector.broadcast %50 : vector<1x1x128xf32> to vector<14x14x128xf32>
      %52 = arith.mulf %47, %51 : vector<14x14x128xf32>
      %53 = arith.addf %46, %52 : vector<14x14x128xf32>
      %54 = vector.extract_strided_slice %30 {offsets = [0, 1, 0], sizes = [16, 14, 128], strides = [1, 1, 1]} : vector<16x16x128xf32> to vector<16x14x128xf32>
      %55 = vector.extract_strided_slice %54 {offsets = [0, 0, 0], sizes = [14, 14, 128], strides = [1, 1, 1]} : vector<16x14x128xf32> to vector<14x14x128xf32>
      %c1 = arith.constant 1 : index
      %c0_32 = arith.constant 0 : index
      %56 = vector.load %arg1[%c1, %c0_32] : memref<9x128xf32, #tpu.memory_space<vmem>>, vector<1x128xf32>
      %57 = vector.shape_cast %56 : vector<1x128xf32> to vector<128xf32>
      %58 = vector.shape_cast %57 : vector<128xf32> to vector<1x1x128xf32>
      %59 = vector.broadcast %58 : vector<1x1x128xf32> to vector<14x14x128xf32>
      %60 = arith.mulf %55, %59 : vector<14x14x128xf32>
      %61 = arith.addf %53, %60 : vector<14x14x128xf32>
      %62 = vector.extract_strided_slice %54 {offsets = [1, 0, 0], sizes = [14, 14, 128], strides = [1, 1, 1]} : vector<16x14x128xf32> to vector<14x14x128xf32>
      %c4 = arith.constant 4 : index
      %c0_33 = arith.constant 0 : index
      %63 = vector.load %arg1[%c4, %c0_33] : memref<9x128xf32, #tpu.memory_space<vmem>>, vector<1x128xf32>
      %64 = vector.shape_cast %63 : vector<1x128xf32> to vector<128xf32>
      %65 = vector.shape_cast %64 : vector<128xf32> to vector<1x1x128xf32>
      %66 = vector.broadcast %65 : vector<1x1x128xf32> to vector<14x14x128xf32>
      %67 = arith.mulf %62, %66 : vector<14x14x128xf32>
      %68 = arith.addf %61, %67 : vector<14x14x128xf32>
      %69 = vector.extract_strided_slice %54 {offsets = [2, 0, 0], sizes = [14, 14, 128], strides = [1, 1, 1]} : vector<16x14x128xf32> to vector<14x14x128xf32>
      %c7 = arith.constant 7 : index
      %c0_34 = arith.constant 0 : index
      %70 = vector.load %arg1[%c7, %c0_34] : memref<9x128xf32, #tpu.memory_space<vmem>>, vector<1x128xf32>
      %71 = vector.shape_cast %70 : vector<1x128xf32> to vector<128xf32>
      %72 = vector.shape_cast %71 : vector<128xf32> to vector<1x1x128xf32>
      %73 = vector.broadcast %72 : vector<1x1x128xf32> to vector<14x14x128xf32>
      %74 = arith.mulf %69, %73 : vector<14x14x128xf32>
      %75 = arith.addf %68, %74 : vector<14x14x128xf32>
      %76 = vector.extract_strided_slice %30 {offsets = [0, 2, 0], sizes = [16, 14, 128], strides = [1, 1, 1]} : vector<16x16x128xf32> to vector<16x14x128xf32>
      %77 = vector.extract_strided_slice %76 {offsets = [0, 0, 0], sizes = [14, 14, 128], strides = [1, 1, 1]} : vector<16x14x128xf32> to vector<14x14x128xf32>
      %c2 = arith.constant 2 : index
      %c0_35 = arith.constant 0 : index
      %78 = vector.load %arg1[%c2, %c0_35] : memref<9x128xf32, #tpu.memory_space<vmem>>, vector<1x128xf32>
      %79 = vector.shape_cast %78 : vector<1x128xf32> to vector<128xf32>
      %80 = vector.shape_cast %79 : vector<128xf32> to vector<1x1x128xf32>
      %81 = vector.broadcast %80 : vector<1x1x128xf32> to vector<14x14x128xf32>
      %82 = arith.mulf %77, %81 : vector<14x14x128xf32>
      %83 = arith.addf %75, %82 : vector<14x14x128xf32>
      %84 = vector.extract_strided_slice %76 {offsets = [1, 0, 0], sizes = [14, 14, 128], strides = [1, 1, 1]} : vector<16x14x128xf32> to vector<14x14x128xf32>
      %c5 = arith.constant 5 : index
      %c0_36 = arith.constant 0 : index
      %85 = vector.load %arg1[%c5, %c0_36] : memref<9x128xf32, #tpu.memory_space<vmem>>, vector<1x128xf32>
      %86 = vector.shape_cast %85 : vector<1x128xf32> to vector<128xf32>
      %87 = vector.shape_cast %86 : vector<128xf32> to vector<1x1x128xf32>
      %88 = vector.broadcast %87 : vector<1x1x128xf32> to vector<14x14x128xf32>
      %89 = arith.mulf %84, %88 : vector<14x14x128xf32>
      %90 = arith.addf %83, %89 : vector<14x14x128xf32>
      %91 = vector.extract_strided_slice %76 {offsets = [2, 0, 0], sizes = [14, 14, 128], strides = [1, 1, 1]} : vector<16x14x128xf32> to vector<14x14x128xf32>
      %c8 = arith.constant 8 : index
      %c0_37 = arith.constant 0 : index
      %92 = vector.load %arg1[%c8, %c0_37] : memref<9x128xf32, #tpu.memory_space<vmem>>, vector<1x128xf32>
      %93 = vector.shape_cast %92 : vector<1x128xf32> to vector<128xf32>
      %94 = vector.shape_cast %93 : vector<128xf32> to vector<1x1x128xf32>
      %95 = vector.broadcast %94 : vector<1x1x128xf32> to vector<14x14x128xf32>
      %96 = arith.mulf %91, %95 : vector<14x14x128xf32>
      %97 = arith.addf %90, %96 : vector<14x14x128xf32>
      %98 = arith.index_cast %25 : i32 to index
      %c0_38 = arith.constant 0 : index
      %c0_39 = arith.constant 0 : index
      %c0_40 = arith.constant 0 : index
      %99 = vector.load %arg4[%98, %c0_38, %c0_39, %c0_40] : memref<2x14x14x128xf32, #tpu.memory_space<vmem>>, vector<1x14x14x128xf32>
      %100 = vector.shape_cast %99 : vector<1x14x14x128xf32> to vector<14x14x128xf32>
      %101 = vector.shape_cast %97 : vector<14x14x128xf32> to vector<1x14x14x128xf32>
      tpu.vector_store %arg4[%98, %c0_38, %c0_39, %c0_40], %101 {strides = array<i32>} : memref<2x14x14x128xf32, #tpu.memory_space<vmem>>, vector<1x14x14x128xf32>,
      %c0_41 = arith.constant 0 : index
      %c0_42 = arith.constant 0 : index
      %102 = vector.load %arg5[%c0_41, %c0_42] : memref<1x128xf32, #tpu.memory_space<vmem>>, vector<1x128xf32>
      %cst_43 = arith.constant dense<0.000000e+00> : vector<128xf32>
      %103 = vector.multi_reduction <add>, %97, %cst_43 [0, 1] : vector<14x14x128xf32> to vector<128xf32>
      %104 = vector.shape_cast %103 : vector<128xf32> to vector<1x128xf32>
      %105 = arith.addf %102, %104 : vector<1x128xf32>
      %c0_44 = arith.constant 0 : index
      %c0_45 = arith.constant 0 : index
      %106 = vector.load %arg5[%c0_44, %c0_45] : memref<1x128xf32, #tpu.memory_space<vmem>>, vector<1x128xf32>
      tpu.vector_store %arg5[%c0_44, %c0_45], %105 {strides = array<i32>} : memref<1x128xf32, #tpu.memory_space<vmem>>, vector<1x128xf32>,
      %c0_46 = arith.constant 0 : index
      %c0_47 = arith.constant 0 : index
      %107 = vector.load %arg6[%c0_46, %c0_47] : memref<1x128xf32, #tpu.memory_space<vmem>>, vector<1x128xf32>
      %108 = arith.mulf %97, %97 : vector<14x14x128xf32>
      %cst_48 = arith.constant dense<0.000000e+00> : vector<128xf32>
      %109 = vector.multi_reduction <add>, %108, %cst_48 [0, 1] : vector<14x14x128xf32> to vector<128xf32>
      %110 = vector.shape_cast %109 : vector<128xf32> to vector<1x128xf32>
      %111 = arith.addf %107, %110 : vector<1x128xf32>
      %c0_49 = arith.constant 0 : index
      %c0_50 = arith.constant 0 : index
      %112 = vector.load %arg6[%c0_49, %c0_50] : memref<1x128xf32, #tpu.memory_space<vmem>>, vector<1x128xf32>
      tpu.vector_store %arg6[%c0_49, %c0_50], %111 {strides = array<i32>} : memref<1x128xf32, #tpu.memory_space<vmem>>, vector<1x128xf32>,
    }
    %c2_i32_4 = arith.constant 2 : i32
    %c0_5 = arith.constant 0 : index
    %c0_6 = arith.constant 0 : index
    %5 = vector.load %arg5[%c0_5, %c0_6] : memref<1x128xf32, #tpu.memory_space<vmem>>, vector<1x128xf32>
    %cst_7 = arith.constant 0.00255102036 : f32
    %6 = vector.broadcast %cst_7 : f32 to vector<1x128xf32>
    %7 = arith.mulf %5, %6 : vector<1x128xf32>
    %c0_8 = arith.constant 0 : index
    %c0_9 = arith.constant 0 : index
    %8 = vector.load %arg6[%c0_8, %c0_9] : memref<1x128xf32, #tpu.memory_space<vmem>>, vector<1x128xf32>
    %cst_10 = arith.constant 0.00255102036 : f32
    %9 = vector.broadcast %cst_10 : f32 to vector<1x128xf32>
    %10 = arith.mulf %8, %9 : vector<1x128xf32>
    %11 = arith.mulf %7, %7 : vector<1x128xf32>
    %12 = arith.subf %10, %11 : vector<1x128xf32>
    %cst_11 = arith.constant 0.000000e+00 : f32
    %13 = vector.broadcast %cst_11 : f32 to vector<1x128xf32>
    %14 = arith.maximumf %12, %13 : vector<1x128xf32>
    %cst_12 = arith.constant 9.99999974E-6 : f32
    %15 = vector.broadcast %cst_12 : f32 to vector<1x128xf32>
    %16 = arith.addf %14, %15 : vector<1x128xf32>
    %17 = math.rsqrt %16 : vector<1x128xf32>
    %c0_13 = arith.constant 0 : index
    %c0_14 = arith.constant 0 : index
    %18 = vector.load %arg2[%c0_13, %c0_14] : memref<1x128xf32, #tpu.memory_space<vmem>>, vector<1x128xf32>
    %19 = arith.mulf %17, %18 : vector<1x128xf32>
    %c0_15 = arith.constant 0 : index
    %c0_16 = arith.constant 0 : index
    %20 = vector.load %arg3[%c0_15, %c0_16] : memref<1x128xf32, #tpu.memory_space<vmem>>, vector<1x128xf32>
    %21 = arith.mulf %7, %19 : vector<1x128xf32>
    %22 = arith.subf %20, %21 : vector<1x128xf32>
    %c0_i32_17 = arith.constant 0 : i32
    %c2_i32_18 = arith.constant 2 : i32
    %23 = arith.addi %c0_i32_17, %c2_i32_18 : i32
    %c1_i32_19 = arith.constant 1 : i32
    scf.for %arg7 = %c0_i32_17 to %23 step %c1_i32_19  : i32 {
      %c1_i32_21 = arith.constant 1 : i32
      %24 = arith.muli %arg7, %c1_i32_21 : i32
      %c0_i32_22 = arith.constant 0 : i32
      %25 = arith.addi %c0_i32_22, %24 : i32
      %26 = arith.index_cast %25 : i32 to index
      %c0_23 = arith.constant 0 : index
      %c0_24 = arith.constant 0 : index
      %c0_25 = arith.constant 0 : index
      %27 = vector.load %arg4[%26, %c0_23, %c0_24, %c0_25] : memref<2x14x14x128xf32, #tpu.memory_space<vmem>>, vector<1x14x14x128xf32>
      %28 = vector.shape_cast %27 : vector<1x14x14x128xf32> to vector<14x14x128xf32>
      %29 = vector.shape_cast %19 : vector<1x128xf32> to vector<1x1x128xf32>
      %30 = vector.broadcast %29 : vector<1x1x128xf32> to vector<14x14x128xf32>
      %31 = arith.mulf %28, %30 : vector<14x14x128xf32>
      %32 = vector.shape_cast %22 : vector<1x128xf32> to vector<1x1x128xf32>
      %33 = vector.broadcast %32 : vector<1x1x128xf32> to vector<14x14x128xf32>
      %34 = arith.addf %31, %33 : vector<14x14x128xf32>
      %35 = arith.index_cast %25 : i32 to index
      %c0_26 = arith.constant 0 : index
      %c0_27 = arith.constant 0 : index
      %c0_28 = arith.constant 0 : index
      %36 = vector.load %arg4[%35, %c0_26, %c0_27, %c0_28] : memref<2x14x14x128xf32, #tpu.memory_space<vmem>>, vector<1x14x14x128xf32>
      %37 = vector.shape_cast %36 : vector<1x14x14x128xf32> to vector<14x14x128xf32>
      %38 = vector.shape_cast %34 : vector<14x14x128xf32> to vector<1x14x14x128xf32>
      tpu.vector_store %arg4[%35, %c0_26, %c0_27, %c0_28], %38 {strides = array<i32>} : memref<2x14x14x128xf32, #tpu.memory_space<vmem>>, vector<1x14x14x128xf32>,
    }
    %c2_i32_20 = arith.constant 2 : i32
    return
  }
}

</mosaic_0001>

<bundles_post_ra>
// kernel: squeeze.1
= control target key start
LH: loop header
LB: loop body
LE: loop exit
PB: predicated region body
PF: predicated region fallthrough
CT: control target
= control target key end

     0   :  { %vm17_vm0 = vcmask 949248   ;;  %s62_s0 = inlined_call_operand.vmem [shape: f32[116,3,3], index: 0, kind: input, shape index: {}]   ;;  %s63_s1 = inlined_call_operand.vmem [shape: f32[116,9], index: 1, kind: output, shape index: {}]  }
   0x1   :  { %v30_v0 = vld [vmem:[%s62_s0 + $0x8] sm:$0xf]  ;;  %v31_v1 = vld [vmem:[%s62_s0 + $0x4] sm:$0xf]  ;;  %v14_v2 = vld [vmem:[%s62_s0] sm:$0xf] }
   0x2   :  { %9 = vst [vmem:[#allocation0] sm:$0xf] %v30_v0  ;;  %13 = vst [vmem:[#allocation0 + $0x10] sm:$0xf] %v31_v1 }
   0x3   :  { %15 = vst [vmem:[#allocation0 + $0x8] sm:$0xf] %v14_v2 }
   0x9   :  { %v20_v4 = vld [vmem:[#allocation0 + $0x10] sm:$0x7]   ;;  %v25_v5 = vld [vmem:[#allocation0] sm:$0x7]  }
   0xa   :  { %v16_v3 = vld [vmem:[#allocation0 + $0x8] sm:$0x7]   ;;  %32 = vst.msk [vmem:[%s63_s1 + $0x3] sm:$0x7] %vm17_vm0, %v20_v4   ;;  %33 = vst.msk [vmem:[%s63_s1 + $0x6] sm:$0x7] %vm17_vm0, %v25_v5  }
   0xb   :  { %18 = vst.msk [vmem:[%s63_s1] sm:$0x7] %vm17_vm0, %v16_v3  }

// kernel: _fused_relu_dwconv_bn_impl.1
= control target key start
LH: loop header
LB: loop body
LE: loop exit
PB: predicated region body
PF: predicated region fallthrough
CT: control target
= control target key end

     0   :  { %v1608_v0 = vmov 0.0   ;;  %s1634_s15 = smov 0   ;;  %s2933_s0 = inlined_call_operand.vmem [shape: f32[2,16,16,128], index: 0, kind: input, shape index: {}]   ;;  %s2934_s1 = inlined_call_operand.vmem [shape: f32[9,128], index: 1, kind: input, shape index: {}]   ;;  %s2935_s2 = inlined_call_operand.vmem [shape: f32[1,128], index: 2, kind: input, shape index: {}]   ;;  %s2936_s3 = inlined_call_operand.vmem [shape: f32[1,128], index: 3, kind: input, shape index: {}]   ;;  %s2937_s4 = inlined_call_operand.vmem [shape: f32[2,14,14,128], index: 4, kind: output, shape index: {}]  }
   0x1   :  { %17 = vst [vmem:[#allocation2] sm:$0x1] %v1608_v0  ;;  %18 = vst [vmem:[#allocation3] sm:$0x1] %v1608_v0 }
   0x2 LB: > { %s1554_s16 = sshll.u32 %s1602_s15, 8  ;;  %v1643_v1 = vld [vmem:[%s2934_s1] ss:$0 sm:$0xff]  ;;  %v1648_v2 = vld [vmem:[%s2934_s1 + $0x3] ss:$0 sm:$0xff]  ;;  %vm335_vm0 = vcmask 1046528   ;;  %s1602_s15 = sphi %s1634_s15, %s24_s15  }
   0x3   : > { %s1653_s23 = scalar_lea.vmem %s2933_s0, %s1554_s16  ;;  %v1658_v3 = vld [vmem:[%s2934_s1 + $0x6] ss:$0 sm:$0xff]  ;;  %v1663_v4 = vld [vmem:[%s2934_s1 + $0x1] ss:$0 sm:$0xff]  ;;  %v1668_v5 = vld [vmem:[%s2934_s1 + $0x4] ss:$0 sm:$0xff] }
   0x4   : > { %v1673_v6 = vld [vmem:[%s2934_s1 + $0x7] ss:$0 sm:$0xff]  ;;  %v28_v8 = vld [vmem:[%s1653_s23 + $0x8] sm:$0xff]  ;;  %v29_v9 = vld [vmem:[%s1653_s23 + $0x10] sm:$0xff]  ;;  %vm813_vm1 = vcmask 1045504   ;;  %s1230_s12 = smul.u32 224, %s1602_s15 }
   0x5   : > { %v27_v7 = vld [vmem:[%s1653_s23] sm:$0xff]  ;;  %v30_v10 = vld [vmem:[%s1653_s23 + $0x18] sm:$0xff]  ;;  %v32_v12 = vld [vmem:[%s1653_s23 + $0x28] sm:$0xff]  ;;  %v60_v14 = vmax.f32 %v28_v8, 0.0  ;;  %v1681_v15 = vmax.f32 %v29_v9, 0.0  ;;  %s24_s15 = sadd.s32 1, %s1602_s15  }
   0x6   : > { %v31_v11 = vld [vmem:[%s1653_s23 + $0x20] sm:$0xff]  ;;  %v59_v13 = vmax.f32 %v27_v7, 0.0  ;;  %v1683_v16 = vmax.f32 %v30_v10, 0.0  ;;  %v1687_v18 = vmax.f32 %v32_v12, 0.0  ;;  %v1723_v37 = vld [vmem:[%s2934_s1 + $0x8] ss:$0 sm:$0xff]  ;;  %s1790_s16 = scalar_lea.vmem %s2937_s4, %s1230_s12 }
   0x7   : > { %v1685_v17 = vmax.f32 %v31_v11, 0.0  ;;  %v157_v20 = vmul.f32 %v1648_v2, %v1681_v15  ;;  %v280_v22 = vmul.f32 %v1663_v4, %v60_v14  ;;  %v1697_v23 = vld [vmem:[%s2934_s1 + $0x2] ss:$0 sm:$0xff]  ;;  %v439_v25 = vmul.f32 %v1668_v5, %v1681_v15  ;;  %v1716_v32 = vld [vmem:[%s2934_s1 + $0x5] ss:$0 sm:$0xff]  ;;  %v33_v50 = vld [vmem:[%s1653_s23 + $0x30] sm:$0xff] }
   0x8   : > { %v96_v19 = vmul.f32 %v1643_v1, %v59_v13  ;;  %v279_v21 = vmul.f32 %v1663_v4, %v59_v13  ;;  %v1705_v26 = vmul.f32 %v1668_v5, %v1683_v16  ;;  %v1711_v31 = vmul.f32 %v1673_v6, %v1687_v18  ;;  %v34_v55 = vld [vmem:[%s1653_s23 + $0x38] sm:$0xff]  ;;  %p21_p0 = scmp.ge.s32.totalorder %s24_s15, 2  }
   0x9   : > { %v218_v24 = vmul.f32 %v1658_v3, %v1685_v17  ;;  %v598_v27 = vmul.f32 %v1673_v6, %v1685_v17  ;;  %v337_v30 = vrot.slane %v280_v22, 1  ;;  %v495_v33 = vrot.slane %v439_v25, 1  ;;  %s2799_s0 = smov (%p21_p0), 0  }
   0xa   : > { %v185_v28 = vadd.f32 %v157_v20, %v96_v19  ;;  %v336_v29 = vrot.slane %v279_v21, 1  ;;  %v496_v34 = vrot.slane %v1705_v26, 1  ;;  %v757_v36 = vmul.f32 %v1697_v23, %v59_v13 }
   0xb   : > { %v654_v35 = vrot.slane %v598_v27, 1  ;;  %v655_v40 = vrot.slane %v1711_v31, 1  ;;  %v1728_v41 = vmul.f32 %v1697_v23, %v60_v14  ;;  %v917_v44 = vmul.f32 %v1716_v32, %v1681_v15 }
   0xc   : > { %v246_v38 = vadd.f32 %v218_v24, %v185_v28  ;;  %v338_v39 = vsel %vm335_vm0, %v336_v29, %v337_v30  ;;  %v497_v42 = vsel %vm335_vm0, %v495_v33, %v496_v34  ;;  %v814_v43 = vrot.slane %v757_v36, 2 }
   0xd   : > { %v1735_v45 = vmul.f32 %v1716_v32, %v1683_v16  ;;  %v656_v47 = vsel %vm335_vm0, %v654_v35, %v655_v40  ;;  %v815_v48 = vrot.slane %v1728_v41, 2  ;;  %v1076_v49 = vmul.f32 %v1723_v37, %v1685_v17 }
   0xe   : > { %v406_v46 = vadd.f32 %v338_v39, %v246_v38  ;;  %v973_v51 = vrot.slane %v917_v44, 2  ;;  %v1745_v53 = vmul.f32 %v1723_v37, %v1687_v18  ;;  %v97_v54 = vmul.f32 %v1643_v1, %v60_v14 }
   0xf   : > { %v974_v52 = vrot.slane %v1735_v45, 2  ;;  %v816_v57 = vsel %vm813_vm1, %v814_v43, %v815_v48  ;;  %v1132_v58 = vrot.slane %v1076_v49, 2  ;;  %v158_v59 = vmul.f32 %v1648_v2, %v1683_v16 }
  0x10   : > { %v565_v56 = vadd.f32 %v497_v42, %v406_v46  ;;  %v1133_v61 = vrot.slane %v1745_v53, 2  ;;  %v219_v62 = vmul.f32 %v1658_v3, %v1687_v18  ;;  %v1758_v63 = vmax.f32 %v33_v50, 0.0 }
  0x11   : > { %v975_v60 = vsel %vm813_vm1, %v973_v51, %v974_v52  ;;  %v186_v7 = vadd.f32 %v158_v59, %v97_v54  ;;  %v1760_v8 = vmax.f32 %v34_v55, 0.0  ;;  %v98_v9 = vmul.f32 %v1643_v1, %v1681_v15 }
  0x12   : > { %v724_v0 = vadd.f32 %v656_v47, %v565_v56  ;;  %v1134_v10 = vsel %vm813_vm1, %v1132_v58, %v1133_v61  ;;  %v159_v11 = vmul.f32 %v1648_v2, %v1685_v17  ;;  %v220_v12 = vmul.f32 %v1658_v3, %v1758_v63 }
  0x13   : > { %v281_v13 = vmul.f32 %v1663_v4, %v1681_v15  ;;  %v247_v19 = vadd.f32 %v219_v62, %v186_v7  ;;  %v1776_v20 = vmul.f32 %v1663_v4, %v1683_v16  ;;  %v441_v21 = vmul.f32 %v1668_v5, %v1685_v17 }
  0x14   : > { %v884_v14 = vadd.f32 %v816_v57, %v724_v0  ;;  %v187_v22 = vadd.f32 %v159_v11, %v98_v9  ;;  %v1782_v25 = vmul.f32 %v1668_v5, %v1687_v18  ;;  %v600_v26 = vmul.f32 %v1673_v6, %v1758_v63 }
  0x15   : > { %v339_v24 = vrot.slane %v281_v13, 1  ;;  %v407_v28 = vadd.f32 %v337_v30, %v247_v19  ;;  %v340_v29 = vrot.slane %v1776_v20, 1  ;;  %v498_v31 = vrot.slane %v441_v21, 1 }
  0x16   : > { %v1043_v27 = vadd.f32 %v975_v60, %v884_v14  ;;  %v248_v33 = vadd.f32 %v220_v12, %v187_v22  ;;  %v499_v35 = vrot.slane %v1782_v25, 1  ;;  %v1795_v36 = vmul.f32 %v1673_v6, %v1760_v8  ;;  %v35_v60 = vld [vmem:[%s1653_s23 + $0x40] sm:$0xff] }
  0x17   : > { %v657_v38 = vrot.slane %v600_v26, 1  ;;  %v566_v41 = vadd.f32 %v496_v34, %v407_v28  ;;  %v341_v30 = vsel %vm335_vm0, %v339_v24, %v340_v29  ;;  %v759_v42 = vmul.f32 %v1697_v23, %v1681_v15 }
  0x18   : > { %v1202_v39 = vadd.f32 %v1134_v10, %v1043_v27  ;;  %v408_v43 = vadd.f32 %v341_v30, %v248_v33  ;;  %v500_v44 = vsel %vm335_vm0, %v498_v31, %v499_v35  ;;  %v658_v46 = vrot.slane %v1795_v36, 1  ;;  %v36_v10 = vld [vmem:[%s1653_s23 + $0x48] sm:$0xff] }
  0x19   : > { %v1806_v47 = vmul.f32 %v1697_v23, %v1683_v16  ;;  %v725_v34 = vadd.f32 %v655_v40, %v566_v41  ;;  %v817_v50 = vrot.slane %v759_v42, 2  ;;  %v919_v15 = vmul.f32 %v1716_v32, %v1685_v17 }
  0x1a   : > { %1232 = vst [vmem:[%s1790_s16] sm:$0xff] %v1202_v39  ;;  %v1311_v49 = vmul.f32 %v1202_v39, %v1202_v39  ;;  %v567_v51 = vadd.f32 %v500_v44, %v408_v43  ;;  %v659_v54 = vsel %vm335_vm0, %v657_v38, %v658_v46  ;;  %v1817_v56 = vmul.f32 %v1716_v32, %v1687_v18 }
  0x1b   : > { %v818_v55 = vrot.slane %v1806_v47, 2  ;;  %v885_v57 = vadd.f32 %v815_v48, %v725_v34  ;;  %v976_v58 = vrot.slane %v919_v15, 2  ;;  %v1078_v40 = vmul.f32 %v1723_v37, %v1758_v63 }
  0x1c   : > { %v1823_v59 = vmul.f32 %v1723_v37, %v1760_v8  ;;  %v726_v62 = vadd.f32 %v659_v54, %v567_v51  ;;  %v977_v7 = vrot.slane %v1817_v56, 2  ;;  %v99_v9 = vmul.f32 %v1643_v1, %v1683_v16 }
  0x1d   : > { %v819_v0 = vsel %vm813_vm1, %v817_v50, %v818_v55  ;;  %v1044_v48 = vadd.f32 %v974_v52, %v885_v57  ;;  %v1135_v11 = vrot.slane %v1078_v40, 2  ;;  %v160_v13 = vmul.f32 %v1648_v2, %v1687_v18 }
  0x1e   : > { %v1136_v12 = vrot.slane %v1823_v59, 2  ;;  %v886_v14 = vadd.f32 %v819_v0, %v726_v62  ;;  %v978_v19 = vsel %vm813_vm1, %v976_v58, %v977_v7  ;;  %v221_v20 = vmul.f32 %v1658_v3, %v1760_v8 }
  0x1f   : > { %v1839_v21 = vmax.f32 %v35_v60, 0.0  ;;  %v1203_v16 = vadd.f32 %v1133_v61, %v1044_v48  ;;  %v188_v52 = vadd.f32 %v160_v13, %v99_v9  ;;  %v1846_v22 = vmax.f32 %v36_v10, 0.0 }
  0x20   : > { %v1137_v45 = vsel %vm813_vm1, %v1135_v11, %v1136_v12  ;;  %v1045_v24 = vadd.f32 %v978_v19, %v886_v14  ;;  %v100_v26 = vmul.f32 %v1643_v1, %v1685_v17  ;;  %v161_v27 = vmul.f32 %v1648_v2, %v1758_v63 }
  0x21   : > { %v222_v28 = vmul.f32 %v1658_v3, %v1839_v21  ;;  %1233 = vst [vmem:[%s1790_s16 + $0x8] sm:$0x3f] %v1203_v16  ;;  %v1261_v53 = vsel %vm813_vm1, %v1203_v16, 0.0  ;;  %v1312_v61 = vmul.f32 %v1203_v16, %v1203_v16  ;;  %v249_v31 = vadd.f32 %v221_v20, %v188_v52 }
  0x22   : > { %v283_v33 = vmul.f32 %v1663_v4, %v1685_v17  ;;  %v1262_v38 = vadd.f32 %v1261_v53, %v1202_v39  ;;  %v1204_v41 = vadd.f32 %v1137_v45, %v1045_v24  ;;  %v189_v30 = vadd.f32 %v161_v27, %v100_v26  ;;  %v37_v26 = vld [vmem:[%s1653_s23 + $0x50] sm:$0xff]  ;;  %v38_v27 = vld [vmem:[%s1653_s23 + $0x58] sm:$0xff] }
  0x23   : > { %v1860_v42 = vmul.f32 %v1663_v4, %v1687_v18  ;;  %v1339_v43 = vsel %vm813_vm1, %v1312_v61, 0.0  ;;  %v409_v44 = vadd.f32 %v340_v29, %v249_v31  ;;  %v443_v34 = vmul.f32 %v1668_v5, %v1758_v63 }
  0x24   : > { %v342_v47 = vrot.slane %v283_v33, 1  ;;  %v1340_v50 = vadd.f32 %v1339_v43, %v1311_v49  ;;  %1234 = vst [vmem:[%s1790_s16 + $0x10] sm:$0xff] %v1204_v41  ;;  %v1263_v15 = vadd.f32 %v1262_v38, %v1204_v41  ;;  %v1313_v51 = vmul.f32 %v1204_v41, %v1204_v41 }
  0x25   : > { %v250_v54 = vadd.f32 %v222_v28, %v189_v30  ;;  %v568_v39 = vadd.f32 %v499_v35, %v409_v44  ;;  %v343_v56 = vrot.slane %v1860_v42, 1  ;;  %v1871_v57 = vmul.f32 %v1668_v5, %v1760_v8 }
  0x26   : > { %v501_v58 = vrot.slane %v443_v34, 1  ;;  %v1341_v29 = vadd.f32 %v1340_v50, %v1313_v51  ;;  %v602_v40 = vmul.f32 %v1673_v6, %v1839_v21  ;;  %v1877_v49 = vmul.f32 %v1673_v6, %v1846_v22 }
  0x27   : > { %v761_v60 = vmul.f32 %v1697_v23, %v1685_v17  ;;  %v727_v25 = vadd.f32 %v658_v46, %v568_v39  ;;  %v344_v35 = vsel %vm335_vm0, %v342_v47, %v343_v56  ;;  %v502_v62 = vrot.slane %v1871_v57, 1 }
  0x28   : > { %v1887_v0 = vmul.f32 %v1697_v23, %v1687_v18  ;;  %v410_v9 = vadd.f32 %v344_v35, %v250_v54  ;;  %v660_v10 = vrot.slane %v602_v40, 1  ;;  %v661_v48 = vrot.slane %v1877_v49, 1 }
  0x29   : > { %v820_v11 = vrot.slane %v761_v60, 2  ;;  %v887_v13 = vadd.f32 %v818_v55, %v727_v25  ;;  %v503_v17 = vsel %vm335_vm0, %v501_v58, %v502_v62  ;;  %v921_v46 = vmul.f32 %v1716_v32, %v1758_v63 }
  0x2a   : > { %v821_v36 = vrot.slane %v1887_v0, 2  ;;  %v569_v14 = vadd.f32 %v503_v17, %v410_v9  ;;  %v662_v19 = vsel %vm335_vm0, %v660_v10, %v661_v48  ;;  %v1897_v20 = vmul.f32 %v1716_v32, %v1760_v8 }
  0x2b   : > { %v1080_v16 = vmul.f32 %v1723_v37, %v1839_v21  ;;  %v1046_v45 = vadd.f32 %v977_v7, %v887_v13  ;;  %v979_v52 = vrot.slane %v921_v46, 2  ;;  %v1906_v24 = vmul.f32 %v1723_v37, %v1846_v22 }
  0x2c   : > { %v822_v55 = vsel %vm813_vm1, %v820_v11, %v821_v36  ;;  %v728_v28 = vadd.f32 %v662_v19, %v569_v14  ;;  %v980_v53 = vrot.slane %v1897_v20, 2  ;;  %v101_v31 = vmul.f32 %v1643_v1, %v1687_v18 }
  0x2d   : > { %v1138_v61 = vrot.slane %v1080_v16, 2  ;;  %v1205_v7 = vadd.f32 %v1136_v12, %v1046_v45  ;;  %v1139_v33 = vrot.slane %v1906_v24, 2  ;;  %v162_v38 = vmul.f32 %v1648_v2, %v1760_v8 }
  0x2e   : > { %v223_v41 = vmul.f32 %v1658_v3, %v1846_v22  ;;  %v888_v30 = vadd.f32 %v822_v55, %v728_v28  ;;  %v981_v42 = vsel %vm813_vm1, %v979_v52, %v980_v53  ;;  %v1921_v43 = vmax.f32 %v37_v26, 0.0 }
  0x2f   : > { %v1923_v44 = vmax.f32 %v38_v27, 0.0  ;;  %1235 = vst [vmem:[%s1790_s16 + $0x18] sm:$0x3f] %v1205_v7  ;;  %v1264_v18 = vsel %vm813_vm1, %v1205_v7, 0.0  ;;  %v1314_v59 = vmul.f32 %v1205_v7, %v1205_v7  ;;  %v1140_v12 = vsel %vm813_vm1, %v1138_v61, %v1139_v33 }
  0x30   : > { %v190_v47 = vadd.f32 %v162_v38, %v101_v31  ;;  %v1265_v34 = vadd.f32 %v1264_v18, %v1263_v15  ;;  %v1047_v50 = vadd.f32 %v981_v42, %v888_v30  ;;  %v102_v51 = vmul.f32 %v1643_v1, %v1758_v63 }
  0x31   : > { %v163_v54 = vmul.f32 %v1648_v2, %v1839_v21  ;;  %v1342_v39 = vsel %vm813_vm1, %v1314_v59, 0.0  ;;  %v224_v58 = vmul.f32 %v1658_v3, %v1921_v43  ;;  %v285_v40 = vmul.f32 %v1663_v4, %v1758_v63 }
  0x32   : > { %v251_v57 = vadd.f32 %v223_v41, %v190_v47  ;;  %v1343_v49 = vadd.f32 %v1342_v39, %v1341_v29  ;;  %v1206_v60 = vadd.f32 %v1140_v12, %v1047_v50  ;;  %v1941_v25 = vmul.f32 %v1663_v4, %v1760_v8  ;;  %v39_v50 = vld [vmem:[%s1653_s23 + $0x60] sm:$0xff] }
  0x33   : > { %v191_v15 = vadd.f32 %v163_v54, %v102_v51  ;;  %v345_v9 = vrot.slane %v285_v40, 1  ;;  %v445_v10 = vmul.f32 %v1668_v5, %v1839_v21  ;;  %v1947_v11 = vmul.f32 %v1668_v5, %v1846_v22  ;;  %v40_v51 = vld [vmem:[%s1653_s23 + $0x68] sm:$0xff] }
  0x34   : > { %v411_v35 = vadd.f32 %v343_v56, %v251_v57  ;;  %1236 = vst [vmem:[%s1790_s16 + $0x20] sm:$0xff] %v1206_v60  ;;  %v1266_v13 = vadd.f32 %v1265_v34, %v1206_v60  ;;  %v1315_v17 = vmul.f32 %v1206_v60, %v1206_v60  ;;  %v346_v29 = vrot.slane %v1941_v25, 1 }
  0x35   : > { %v252_v46 = vadd.f32 %v224_v58, %v191_v15  ;;  %v504_v19 = vrot.slane %v445_v10, 1  ;;  %v505_v20 = vrot.slane %v1947_v11, 1  ;;  %v604_v56 = vmul.f32 %v1673_v6, %v1921_v43 }
  0x36   : > { %v570_v14 = vadd.f32 %v502_v62, %v411_v35  ;;  %v1344_v16 = vadd.f32 %v1343_v49, %v1315_v17  ;;  %v347_v45 = vsel %vm335_vm0, %v345_v9, %v346_v29  ;;  %v1957_v55 = vmul.f32 %v1673_v6, %v1923_v44 }
  0x37   : > { %v763_v52 = vmul.f32 %v1697_v23, %v1758_v63  ;;  %v412_v27 = vadd.f32 %v347_v45, %v252_v46  ;;  %v506_v62 = vsel %vm335_vm0, %v504_v19, %v505_v20  ;;  %v663_v28 = vrot.slane %v604_v56, 1 }
  0x38   : > { %v729_v26 = vadd.f32 %v661_v48, %v570_v14  ;;  %v664_v61 = vrot.slane %v1957_v55, 1  ;;  %v1965_v31 = vmul.f32 %v1697_v23, %v1760_v8  ;;  %v923_v38 = vmul.f32 %v1716_v32, %v1839_v21 }
  0x39   : > { %v823_v7 = vrot.slane %v763_v52, 2  ;;  %v571_v48 = vadd.f32 %v506_v62, %v412_v27  ;;  %v1973_v41 = vmul.f32 %v1716_v32, %v1846_v22  ;;  %v1082_v30 = vmul.f32 %v1723_v37, %v1921_v43 }
  0x3a   : > { %v889_v63 = vadd.f32 %v821_v36, %v729_v26  ;;  %v665_v42 = vsel %vm335_vm0, %v663_v28, %v664_v61  ;;  %v824_v18 = vrot.slane %v1965_v31, 2  ;;  %v982_v59 = vrot.slane %v923_v38, 2 }
  0x3b   : > { %v1981_v12 = vmul.f32 %v1723_v37, %v1923_v44  ;;  %v730_v0 = vadd.f32 %v665_v42, %v571_v48  ;;  %v983_v36 = vrot.slane %v1973_v41, 2  ;;  %v1141_v34 = vrot.slane %v1082_v30, 2 }
  0x3c   : > { %v1048_v47 = vadd.f32 %v980_v53, %v889_v63  ;;  %v825_v54 = vsel %vm813_vm1, %v823_v7, %v824_v18  ;;  %v103_v57 = vmul.f32 %v1643_v1, %v1760_v8  ;;  %v164_v58 = vmul.f32 %v1648_v2, %v1846_v22 }
  0x3d   : > { %v1142_v39 = vrot.slane %v1981_v12, 2  ;;  %v890_v40 = vadd.f32 %v825_v54, %v730_v0  ;;  %v984_v49 = vsel %vm813_vm1, %v982_v59, %v983_v36  ;;  %v225_v60 = vmul.f32 %v1658_v3, %v1923_v44 }
  0x3e   : > { %v1207_v53 = vadd.f32 %v1139_v33, %v1048_v47  ;;  %v192_v25 = vadd.f32 %v164_v58, %v103_v57  ;;  %v2000_v35 = vmax.f32 %v39_v50, 0.0  ;;  %v2002_v8 = vmax.f32 %v40_v51, 0.0 }
  0x3f   : > { %v1143_v15 = vsel %vm813_vm1, %v1141_v34, %v1142_v39  ;;  %v1049_v33 = vadd.f32 %v984_v49, %v890_v40  ;;  %v104_v10 = vmul.f32 %v1643_v1, %v1839_v21  ;;  %v165_v46 = vmul.f32 %v1648_v2, %v1921_v43 }
  0x40   : > { %1237 = vst [vmem:[%s1790_s16 + $0x28] sm:$0x3f] %v1207_v53  ;;  %v1267_v9 = vsel %vm813_vm1, %v1207_v53, 0.0  ;;  %v1316_v24 = vmul.f32 %v1207_v53, %v1207_v53  ;;  %v253_v17 = vadd.f32 %v225_v60, %v192_v25  ;;  %v226_v14 = vmul.f32 %v1658_v3, %v2000_v35 }
  0x41   : > { %v1268_v11 = vadd.f32 %v1267_v9, %v1266_v13  ;;  %v1208_v56 = vadd.f32 %v1143_v15, %v1049_v33  ;;  %v287_v45 = vmul.f32 %v1663_v4, %v1839_v21  ;;  %v2017_v55 = vmul.f32 %v1663_v4, %v1846_v22 }
  0x42   : > { %v1345_v19 = vsel %vm813_vm1, %v1316_v24, 0.0  ;;  %v413_v26 = vadd.f32 %v346_v29, %v253_v17  ;;  %v193_v13 = vadd.f32 %v165_v46, %v104_v10  ;;  %v447_v27 = vmul.f32 %v1668_v5, %v1921_v43  ;;  %v41_v24 = vld [vmem:[%s1653_s23 + $0x70] sm:$0xff]  ;;  %v42_v17 = vld [vmem:[%s1653_s23 + $0x78] sm:$0xff] }
  0x43   : > { %v1346_v52 = vadd.f32 %v1345_v19, %v1344_v16  ;;  %1238 = vst [vmem:[%s1790_s16 + $0x30] sm:$0xff] %v1208_v56  ;;  %v1269_v62 = vadd.f32 %v1268_v11, %v1208_v56  ;;  %v1317_v28 = vmul.f32 %v1208_v56, %v1208_v56  ;;  %v348_v31 = vrot.slane %v287_v45, 1 }
  0x44   : > { %v349_v7 = vrot.slane %v2017_v55, 1  ;;  %v572_v38 = vadd.f32 %v505_v20, %v413_v26  ;;  %v254_v63 = vadd.f32 %v226_v14, %v193_v13  ;;  %v2025_v48 = vmul.f32 %v1668_v5, %v1923_v44 }
  0x45   : > { %v507_v41 = vrot.slane %v447_v27, 1  ;;  %v1347_v30 = vadd.f32 %v1346_v52, %v1317_v28  ;;  %v606_v16 = vmul.f32 %v1673_v6, %v2000_v35  ;;  %v2032_v42 = vmul.f32 %v1673_v6, %v2002_v8 }
  0x46   : > { %v350_v29 = vsel %vm335_vm0, %v348_v31, %v349_v7  ;;  %v731_v59 = vadd.f32 %v664_v61, %v572_v38  ;;  %v508_v20 = vrot.slane %v2025_v48, 1  ;;  %v765_v0 = vmul.f32 %v1697_v23, %v1839_v21 }
  0x47   : > { %v414_v47 = vadd.f32 %v350_v29, %v254_v63  ;;  %v666_v34 = vrot.slane %v606_v16, 1  ;;  %v667_v50 = vrot.slane %v2032_v42, 1  ;;  %v2040_v51 = vmul.f32 %v1697_v23, %v1846_v22 }
  0x48   : > { %v925_v54 = vmul.f32 %v1716_v32, %v1921_v43  ;;  %v891_v57 = vadd.f32 %v824_v18, %v731_v59  ;;  %v509_v61 = vsel %vm335_vm0, %v507_v41, %v508_v20  ;;  %v826_v58 = vrot.slane %v765_v0, 2 }
  0x49   : > { %v2047_v53 = vmul.f32 %v1716_v32, %v1923_v44  ;;  %v573_v21 = vadd.f32 %v509_v61, %v414_v47  ;;  %v668_v40 = vsel %vm335_vm0, %v666_v34, %v667_v50  ;;  %v827_v49 = vrot.slane %v2040_v51, 2 }
  0x4a   : > { %v985_v60 = vrot.slane %v925_v54, 2  ;;  %v1050_v15 = vadd.f32 %v983_v36, %v891_v57  ;;  %v1084_v18 = vmul.f32 %v1723_v37, %v2000_v35  ;;  %v2056_v9 = vmul.f32 %v1723_v37, %v2002_v8 }
  0x4b   : > { %v986_v25 = vrot.slane %v2047_v53, 2  ;;  %v732_v33 = vadd.f32 %v668_v40, %v573_v21  ;;  %v828_v10 = vsel %vm813_vm1, %v826_v58, %v827_v49  ;;  %v105_v11 = vmul.f32 %v1643_v1, %v1846_v22 }
  0x4c   : > { %v166_v36 = vmul.f32 %v1648_v2, %v1923_v44  ;;  %v1209_v46 = vadd.f32 %v1142_v39, %v1050_v15  ;;  %v1144_v19 = vrot.slane %v1084_v18, 2  ;;  %v1145_v56 = vrot.slane %v2056_v9, 2 }
  0x4d   : > { %v987_v14 = vsel %vm813_vm1, %v985_v60, %v986_v25  ;;  %v892_v45 = vadd.f32 %v828_v10, %v732_v33  ;;  %v227_v52 = vmul.f32 %v1658_v3, %v2002_v8  ;;  %v2073_v22 = vmax.f32 %v41_v24, 0.0 }
  0x4e   : > { %v194_v55 = vadd.f32 %v166_v36, %v105_v11  ;;  %1239 = vst [vmem:[%s1790_s16 + $0x38] sm:$0x3f] %v1209_v46  ;;  %v1270_v26 = vsel %vm813_vm1, %v1209_v46, 0.0  ;;  %v1318_v13 = vmul.f32 %v1209_v46, %v1209_v46  ;;  %v1146_v12 = vsel %vm813_vm1, %v1144_v19, %v1145_v56 }
  0x4f   : > { %v2078_v39 = vmax.f32 %v42_v17, 0.0  ;;  %v1271_v27 = vadd.f32 %v1270_v26, %v1269_v62  ;;  %v1051_v28 = vadd.f32 %v987_v14, %v892_v45  ;;  %v106_v38 = vmul.f32 %v1643_v1, %v1921_v43 }
  0x50   : > { %v255_v31 = vadd.f32 %v227_v52, %v194_v55  ;;  %v1348_v63 = vsel %vm813_vm1, %v1318_v13, 0.0  ;;  %v167_v48 = vmul.f32 %v1648_v2, %v2000_v35  ;;  %v228_v41 = vmul.f32 %v1658_v3, %v2073_v22 }
  0x51   : > { %v289_v29 = vmul.f32 %v1663_v4, %v1921_v43  ;;  %v1349_v16 = vadd.f32 %v1348_v63, %v1347_v30  ;;  %v1210_v42 = vadd.f32 %v1146_v12, %v1051_v28  ;;  %v2091_v59 = vmul.f32 %v1663_v4, %v1923_v44  ;;  %v43_v28 = vld [vmem:[%s1653_s23 + $0x80] sm:$0xff]  ;;  %v44_v63 = vld [vmem:[%s1653_s23 + $0x88] sm:$0xff] }
  0x52   : > { %v415_v62 = vadd.f32 %v349_v7, %v255_v31  ;;  %v195_v47 = vadd.f32 %v167_v48, %v106_v38  ;;  %v449_v34 = vmul.f32 %v1668_v5, %v2000_v35  ;;  %v2097_v51 = vmul.f32 %v1668_v5, %v2002_v8 }
  0x53   : > { %v351_v0 = vrot.slane %v289_v29, 1  ;;  %1240 = vst [vmem:[%s1790_s16 + $0x40] sm:$0xff] %v1210_v42  ;;  %v1272_v54 = vadd.f32 %v1271_v27, %v1210_v42  ;;  %v1319_v57 = vmul.f32 %v1210_v42, %v1210_v42  ;;  %v352_v30 = vrot.slane %v2091_v59, 1 }
  0x54   : > { %v574_v61 = vadd.f32 %v508_v20, %v415_v62  ;;  %v256_v7 = vadd.f32 %v228_v41, %v195_v47  ;;  %v510_v58 = vrot.slane %v449_v34, 1  ;;  %v511_v21 = vrot.slane %v2097_v51, 1 }
  0x55   : > { %v608_v40 = vmul.f32 %v1673_v6, %v2073_v22  ;;  %v1350_v60 = vadd.f32 %v1349_v16, %v1319_v57  ;;  %v353_v18 = vsel %vm335_vm0, %v351_v0, %v352_v30  ;;  %v2107_v9 = vmul.f32 %v1673_v6, %v2078_v39 }
  0x56   : > { %v733_v15 = vadd.f32 %v667_v50, %v574_v61  ;;  %v416_v24 = vadd.f32 %v353_v18, %v256_v7  ;;  %v512_v20 = vsel %vm335_vm0, %v510_v58, %v511_v21  ;;  %v767_v10 = vmul.f32 %v1697_v23, %v1921_v43 }
  0x57   : > { %v669_v33 = vrot.slane %v608_v40, 1  ;;  %v670_v36 = vrot.slane %v2107_v9, 1  ;;  %v2115_v50 = vmul.f32 %v1697_v23, %v1923_v44  ;;  %v927_v17 = vmul.f32 %v1716_v32, %v2000_v35 }
  0x58   : > { %v893_v11 = vadd.f32 %v827_v49, %v733_v15  ;;  %v575_v46 = vadd.f32 %v512_v20, %v416_v24  ;;  %v829_v14 = vrot.slane %v767_v10, 2  ;;  %v2121_v19 = vmul.f32 %v1716_v32, %v2002_v8 }
  0x59   : > { %v1086_v43 = vmul.f32 %v1723_v37, %v2073_v22  ;;  %v671_v45 = vsel %vm335_vm0, %v669_v33, %v670_v36  ;;  %v830_v55 = vrot.slane %v2115_v50, 2  ;;  %v988_v52 = vrot.slane %v927_v17, 2 }
  0x5a   : > { %v1052_v49 = vadd.f32 %v986_v25, %v893_v11  ;;  %v734_v26 = vadd.f32 %v671_v45, %v575_v46  ;;  %v989_v13 = vrot.slane %v2121_v19, 2  ;;  %v2132_v12 = vmul.f32 %v1723_v37, %v2078_v39 }
  0x5b   : > { %v1147_v27 = vrot.slane %v1086_v43, 2  ;;  %v831_v38 = vsel %vm813_vm1, %v829_v14, %v830_v55  ;;  %v107_v53 = vmul.f32 %v1643_v1, %v1923_v44  ;;  %v168_v25 = vmul.f32 %v1648_v2, %v2002_v8 }
  0x5c   : > { %v1211_v31 = vadd.f32 %v1145_v56, %v1052_v49  ;;  %v894_v48 = vadd.f32 %v831_v38, %v734_v26  ;;  %v990_v41 = vsel %vm813_vm1, %v988_v52, %v989_v13  ;;  %v1148_v29 = vrot.slane %v2132_v12, 2 }
  0x5d   : > { %v229_v16 = vmul.f32 %v1658_v3, %v2078_v39  ;;  %v196_v62 = vadd.f32 %v168_v25, %v107_v53  ;;  %v2149_v44 = vmax.f32 %v43_v28, 0.0  ;;  %v2152_v34 = vmax.f32 %v44_v63, 0.0 }
  0x5e   : > { %1241 = vst [vmem:[%s1790_s16 + $0x48] sm:$0x3f] %v1211_v31  ;;  %v1273_v56 = vsel %vm813_vm1, %v1211_v31, 0.0  ;;  %v1320_v42 = vmul.f32 %v1211_v31, %v1211_v31  ;;  %v1053_v47 = vadd.f32 %v990_v41, %v894_v48  ;;  %v1149_v0 = vsel %vm813_vm1, %v1147_v27, %v1148_v29 }
  0x5f   : > { %v1274_v59 = vadd.f32 %v1273_v56, %v1272_v54  ;;  %v257_v57 = vadd.f32 %v229_v16, %v196_v62  ;;  %v108_v61 = vmul.f32 %v1643_v1, %v2000_v35  ;;  %v169_v7 = vmul.f32 %v1648_v2, %v2073_v22 }
  0x60   : > { %v1351_v51 = vsel %vm813_vm1, %v1320_v42, 0.0  ;;  %v1212_v40 = vadd.f32 %v1149_v0, %v1053_v47  ;;  %v230_v54 = vmul.f32 %v1658_v3, %v2149_v44  ;;  %v291_v15 = vmul.f32 %v1663_v4, %v2000_v35  ;;  %v46_v47 = vld [vmem:[%s1653_s23 + $0x98] sm:$0xff] }
  0x61   : > { %v1352_v58 = vadd.f32 %v1351_v51, %v1350_v60  ;;  %v417_v18 = vadd.f32 %v352_v30, %v257_v57  ;;  %v197_v9 = vadd.f32 %v169_v7, %v108_v61  ;;  %v2165_v24 = vmul.f32 %v1663_v4, %v2002_v8 }
  0x62   : > { %v451_v20 = vmul.f32 %v1668_v5, %v2073_v22  ;;  %1242 = vst [vmem:[%s1790_s16 + $0x50] sm:$0xff] %v1212_v40  ;;  %v1275_v33 = vadd.f32 %v1274_v59, %v1212_v40  ;;  %v1321_v10 = vmul.f32 %v1212_v40, %v1212_v40  ;;  %v354_v60 = vrot.slane %v291_v15, 1  ;;  %v45_v59 = vld [vmem:[%s1653_s23 + $0x90] sm:$0xff] }
  0x63   : > { %v2172_v11 = vmul.f32 %v1668_v5, %v2078_v39  ;;  %v576_v50 = vadd.f32 %v511_v21, %v417_v18  ;;  %v258_v17 = vadd.f32 %v230_v54, %v197_v9  ;;  %v355_v30 = vrot.slane %v2165_v24, 1 }
  0x64   : > { %v513_v46 = vrot.slane %v451_v20, 1  ;;  %v1353_v14 = vadd.f32 %v1352_v58, %v1321_v10  ;;  %v610_v49 = vmul.f32 %v1673_v6, %v2149_v44  ;;  %v2180_v45 = vmul.f32 %v1673_v6, %v2152_v34 }
  0x65   : > { %v514_v43 = vrot.slane %v2172_v11, 1  ;;  %v735_v52 = vadd.f32 %v670_v36, %v576_v50  ;;  %v356_v26 = vsel %vm335_vm0, %v354_v60, %v355_v30  ;;  %v769_v21 = vmul.f32 %v1697_v23, %v2000_v35 }
  0x66   : > { %v2187_v12 = vmul.f32 %v1697_v23, %v2002_v8  ;;  %v418_v27 = vadd.f32 %v356_v26, %v258_v17  ;;  %v672_v31 = vrot.slane %v610_v49, 1  ;;  %v673_v38 = vrot.slane %v2180_v45, 1 }
  0x67   : > { %v515_v28 = vsel %vm335_vm0, %v513_v46, %v514_v43  ;;  %v895_v36 = vadd.f32 %v830_v55, %v735_v52  ;;  %v832_v53 = vrot.slane %v769_v21, 2  ;;  %v929_v35 = vmul.f32 %v1716_v32, %v2073_v22 }
  0x68   : > { %v833_v25 = vrot.slane %v2187_v12, 2  ;;  %v577_v63 = vadd.f32 %v515_v28, %v418_v27  ;;  %v674_v48 = vsel %vm335_vm0, %v672_v31, %v673_v38  ;;  %v2199_v41 = vmul.f32 %v1716_v32, %v2078_v39 }
  0x69   : > { %v1088_v16 = vmul.f32 %v1723_v37, %v2149_v44  ;;  %v1054_v56 = vadd.f32 %v989_v13, %v895_v36  ;;  %v991_v42 = vrot.slane %v929_v35, 2  ;;  %v2210_v62 = vmul.f32 %v1723_v37, %v2152_v34 }
  0x6a   : > { %v834_v55 = vsel %vm813_vm1, %v832_v53, %v833_v25  ;;  %v736_v0 = vadd.f32 %v674_v48, %v577_v63  ;;  %v992_v51 = vrot.slane %v2199_v41, 2  ;;  %v109_v19 = vmul.f32 %v1643_v1, %v2002_v8 }
  0x6b   : > { %v1150_v57 = vrot.slane %v1088_v16, 2  ;;  %v1213_v13 = vadd.f32 %v1148_v29, %v1054_v56  ;;  %v1151_v61 = vrot.slane %v2210_v62, 2  ;;  %v170_v7 = vmul.f32 %v1648_v2, %v2078_v39 }
  0x6c   : > { %v231_v58 = vmul.f32 %v1658_v3, %v2152_v34  ;;  %v896_v40 = vadd.f32 %v834_v55, %v736_v0  ;;  %v993_v54 = vsel %vm813_vm1, %v991_v42, %v992_v51  ;;  %v2223_v15 = vmax.f32 %v45_v59, 0.0 }
  0x6d   : > { %v2225_v18 = vmax.f32 %v46_v47, 0.0  ;;  %1243 = vst [vmem:[%s1790_s16 + $0x58] sm:$0x3f] %v1213_v13  ;;  %v1276_v9 = vsel %vm813_vm1, %v1213_v13, 0.0  ;;  %v1322_v8 = vmul.f32 %v1213_v13, %v1213_v13  ;;  %v1152_v29 = vsel %vm813_vm1, %v1150_v57, %v1151_v61 }
  0x6e   : > { %v198_v24 = vadd.f32 %v170_v7, %v109_v19  ;;  %v1277_v20 = vadd.f32 %v1276_v9, %v1275_v33  ;;  %v1055_v10 = vadd.f32 %v993_v54, %v896_v40  ;;  %v110_v60 = vmul.f32 %v1643_v1, %v2073_v22  ;;  %v48_v40 = vld [vmem:[%s1653_s23 + $0xa8] sm:$0xff] }
  0x6f   : > { %v171_v50 = vmul.f32 %v1648_v2, %v2149_v44  ;;  %v1354_v17 = vsel %vm813_vm1, %v1322_v8, 0.0  ;;  %v232_v49 = vmul.f32 %v1658_v3, %v2223_v15  ;;  %v293_v45 = vmul.f32 %v1663_v4, %v2073_v22  ;;  %v2301_v8 = vld [vmem:[%s2934_s1] ss:$0 sm:$0xff] }
  0x70   : > { %v259_v46 = vadd.f32 %v231_v58, %v198_v24  ;;  %v1355_v52 = vadd.f32 %v1354_v17, %v1353_v14  ;;  %v1214_v26 = vadd.f32 %v1152_v29, %v1055_v10  ;;  %v2243_v21 = vmul.f32 %v1663_v4, %v2078_v39  ;;  %v47_v58 = vld [vmem:[%s1653_s23 + $0xa0] sm:$0xff] }
  0x71   : > { %v199_v33 = vadd.f32 %v171_v50, %v110_v60  ;;  %v357_v27 = vrot.slane %v293_v45, 1  ;;  %v453_v2 = vmul.f32 %v1668_v5, %v2149_v44  ;;  %v2249_v28 = vmul.f32 %v1668_v5, %v2152_v34 }
  0x72   : > { %v419_v1 = vadd.f32 %v355_v30, %v259_v46  ;;  %1244 = vst [vmem:[%s1790_s16 + $0x60] sm:$0xff] %v1214_v26  ;;  %v1278_v3 = vadd.f32 %v1277_v20, %v1214_v26  ;;  %v1323_v31 = vmul.f32 %v1214_v26, %v1214_v26  ;;  %v358_v14 = vrot.slane %v2243_v21, 1 }
  0x73   : > { %v260_v36 = vadd.f32 %v232_v49, %v199_v33  ;;  %v516_v4 = vrot.slane %v453_v2, 1  ;;  %v517_v30 = vrot.slane %v2249_v28, 1  ;;  %v612_v35 = vmul.f32 %v1673_v6, %v2223_v15 }
  0x74   : > { %v578_v53 = vadd.f32 %v514_v43, %v419_v1  ;;  %v1356_v63 = vadd.f32 %v1355_v52, %v1323_v31  ;;  %v359_v48 = vsel %vm335_vm0, %v357_v27, %v358_v14  ;;  %v2261_v5 = vmul.f32 %v1673_v6, %v2225_v18  ;;  %v2343_v31 = vld [vmem:[%s2934_s1 + $0x1] ss:$0 sm:$0xff] }
  0x75   : > { %v771_v41 = vmul.f32 %v1697_v23, %v2073_v22  ;;  %v420_v56 = vadd.f32 %v359_v48, %v260_v36  ;;  %v518_v11 = vsel %vm335_vm0, %v516_v4, %v517_v30  ;;  %v675_v43 = vrot.slane %v612_v35, 1  ;;  %v2354_v48 = vld [vmem:[%s2934_s1 + $0x4] ss:$0 sm:$0xff] }
  0x76   : > { %v737_v16 = vadd.f32 %v673_v38, %v578_v53  ;;  %v676_v55 = vrot.slane %v2261_v5, 1  ;;  %v2271_v42 = vmul.f32 %v1697_v23, %v2078_v39  ;;  %v931_v59 = vmul.f32 %v1716_v32, %v2149_v44  ;;  %v2396_v5 = vld [vmem:[%s2934_s1 + $0x5] ss:$0 sm:$0xff] }
  0x77   : > { %v835_v6 = vrot.slane %v771_v41, 2  ;;  %v579_v38 = vadd.f32 %v518_v11, %v420_v56  ;;  %v2279_v47 = vmul.f32 %v1716_v32, %v2152_v34  ;;  %v1090_v0 = vmul.f32 %v1723_v37, %v2223_v15 }
  0x78   : > { %v897_v22 = vadd.f32 %v833_v25, %v737_v16  ;;  %v677_v23 = vsel %vm335_vm0, %v675_v43, %v676_v55  ;;  %v836_v57 = vrot.slane %v2271_v42, 2  ;;  %v994_v19 = vrot.slane %v931_v59, 2 }
  0x79   : > { %v2289_v13 = vmul.f32 %v1723_v37, %v2225_v18  ;;  %v738_v25 = vadd.f32 %v677_v23, %v579_v38  ;;  %v995_v7 = vrot.slane %v2279_v47, 2  ;;  %v1153_v32 = vrot.slane %v1090_v0, 2  ;;  %v2370_v0 = vld [vmem:[%s2934_s1 + $0x7] ss:$0 sm:$0xff] }
  0x7a   : > { %v1056_v12 = vadd.f32 %v992_v51, %v897_v22  ;;  %v837_v54 = vsel %vm813_vm1, %v835_v6, %v836_v57  ;;  %v111_v37 = vmul.f32 %v2301_v8, %v2078_v39  ;;  %v2308_v51 = vld [vmem:[%s2934_s1 + $0x3] ss:$0 sm:$0xff]  ;;  %v2320_v39 = vld [vmem:[%s2934_s1 + $0x6] ss:$0 sm:$0xff]  ;;  %v2327_v62 = vmax.f32 %v47_v58, 0.0 }
  0x7b   : > { %v1154_v9 = vrot.slane %v2289_v13, 2  ;;  %v172_v29 = vmul.f32 %v2308_v51, %v2152_v34  ;;  %v898_v20 = vadd.f32 %v837_v54, %v738_v25  ;;  %v996_v10 = vsel %vm813_vm1, %v994_v19, %v995_v7  ;;  %v2384_v25 = vld [vmem:[%s2934_s1 + $0x2] ss:$0 sm:$0xff] }
  0x7c   : > { %v1215_v24 = vadd.f32 %v1151_v61, %v1056_v12  ;;  %v233_v60 = vmul.f32 %v2320_v39, %v2225_v18  ;;  %v2329_v61 = vmax.f32 %v48_v40, 0.0  ;;  %v112_v52 = vmul.f32 %v2301_v8, %v2149_v44 }
  0x7d   : > { %v1155_v50 = vsel %vm813_vm1, %v1153_v32, %v1154_v9  ;;  %v200_v17 = vadd.f32 %v172_v29, %v111_v37  ;;  %v1057_v45 = vadd.f32 %v996_v10, %v898_v20  ;;  %v173_v21 = vmul.f32 %v2308_v51, %v2223_v15 }
  0x7e   : > { %1245 = vst [vmem:[%s1790_s16 + $0x68] sm:$0x3f] %v1215_v24  ;;  %v1279_v46 = vsel %vm813_vm1, %v1215_v24, 0.0  ;;  %v1324_v49 = vmul.f32 %v1215_v24, %v1215_v24  ;;  %v234_v1 = vmul.f32 %v2320_v39, %v2327_v62  ;;  %v295_v36 = vmul.f32 %v2343_v31, %v2149_v44 }
  0x7f   : > { %v1280_v26 = vadd.f32 %v1279_v46, %v1278_v3  ;;  %v261_v33 = vadd.f32 %v233_v60, %v200_v17  ;;  %v1216_v2 = vadd.f32 %v1155_v50, %v1057_v45  ;;  %v2349_v3 = vmul.f32 %v2343_v31, %v2152_v34  ;;  %v49_v45 = vld [vmem:[%s1653_s23 + $0xb0] sm:$0xff] }
  0x80   : > { %v1357_v27 = vsel %vm813_vm1, %v1324_v49, 0.0  ;;  %v201_v35 = vadd.f32 %v173_v21, %v112_v52  ;;  %v455_v41 = vmul.f32 %v2354_v48, %v2223_v15  ;;  %v360_v11 = vrot.slane %v295_v36, 1 }
  0x81   : > { %v1358_v53 = vadd.f32 %v1357_v27, %v1356_v63  ;;  %v421_v4 = vadd.f32 %v358_v14, %v261_v33  ;;  %1246 = vst [vmem:[%s1790_s16 + $0x70] sm:$0xff] %v1216_v2  ;;  %v1281_v16 = vadd.f32 %v1280_v26, %v1216_v2  ;;  %v1325_v56 = vmul.f32 %v1216_v2, %v1216_v2  ;;  %v50_v33 = vld [vmem:[%s1653_s23 + $0xb8] sm:$0xff] }
  0x82   : > { %v361_v43 = vrot.slane %v2349_v3, 1  ;;  %v262_v63 = vadd.f32 %v234_v1, %v201_v35  ;;  %v2364_v14 = vmul.f32 %v2354_v48, %v2225_v18  ;;  %v519_v59 = vrot.slane %v455_v41, 1 }
  0x83   : > { %v580_v6 = vadd.f32 %v517_v30, %v421_v4  ;;  %v1359_v22 = vadd.f32 %v1358_v53, %v1325_v56  ;;  %v614_v23 = vmul.f32 %v2370_v0, %v2327_v62  ;;  %v2376_v28 = vmul.f32 %v2370_v0, %v2329_v61 }
  0x84   : > { %v362_v38 = vsel %vm335_vm0, %v360_v11, %v361_v43  ;;  %v520_v12 = vrot.slane %v2364_v14, 1  ;;  %v773_v32 = vmul.f32 %v2384_v25, %v2149_v44  ;;  %v2391_v54 = vmul.f32 %v2384_v25, %v2152_v34 }
  0x85   : > { %v739_v30 = vadd.f32 %v676_v55, %v580_v6  ;;  %v422_v19 = vadd.f32 %v362_v38, %v262_v63  ;;  %v678_v58 = vrot.slane %v614_v23, 1  ;;  %v679_v40 = vrot.slane %v2376_v28, 1 }
  0x86   : > { %v933_v55 = vmul.f32 %v2396_v5, %v2223_v15  ;;  %v521_v44 = vsel %vm335_vm0, %v519_v59, %v520_v12  ;;  %v838_v29 = vrot.slane %v773_v32, 2  ;;  %v2405_v24 = vmul.f32 %v2396_v5, %v2225_v18 }
  0x87   : > { %v899_v37 = vadd.f32 %v836_v57, %v739_v30  ;;  %v581_v20 = vadd.f32 %v521_v44, %v422_v19  ;;  %v680_v10 = vsel %vm335_vm0, %v678_v58, %v679_v40  ;;  %v839_v60 = vrot.slane %v2391_v54, 2  ;;  %v2415_v57 = vld [vmem:[%s2934_s1 + $0x8] ss:$0 sm:$0xff] }
  0x88   : > { %v997_v50 = vrot.slane %v933_v55, 2  ;;  %v998_v42 = vrot.slane %v2405_v24, 2  ;;  %v1092_v46 = vmul.f32 %v2415_v57, %v2327_v62  ;;  %v2421_v49 = vmul.f32 %v2415_v57, %v2329_v61 }
  0x89   : > { %v1058_v17 = vadd.f32 %v995_v7, %v899_v37  ;;  %v740_v52 = vadd.f32 %v680_v10, %v581_v20  ;;  %v840_v47 = vsel %vm813_vm1, %v838_v29, %v839_v60  ;;  %v113_v7 = vmul.f32 %v2301_v8, %v2152_v34 }
  0x8a   : > { %v174_v26 = vmul.f32 %v2308_v51, %v2225_v18  ;;  %v999_v1 = vsel %vm813_vm1, %v997_v50, %v998_v42  ;;  %v1156_v27 = vrot.slane %v1092_v46, 2  ;;  %v1157_v2 = vrot.slane %v2421_v49, 2 }
  0x8b   : > { %v1217_v21 = vadd.f32 %v1154_v9, %v1058_v17  ;;  %v900_v36 = vadd.f32 %v840_v47, %v740_v52  ;;  %v235_v53 = vmul.f32 %v2320_v39, %v2329_v61  ;;  %v2438_v34 = vmax.f32 %v49_v45, 0.0 }
  0x8c   : > { %v202_v3 = vadd.f32 %v174_v26, %v113_v7  ;;  %v1158_v13 = vsel %vm813_vm1, %v1156_v27, %v1157_v2  ;;  %v2443_v9 = vmax.f32 %v50_v33, 0.0  ;;  %v114_v6 = vmul.f32 %v2301_v8, %v2223_v15 }
  0x8d   : > { %1247 = vst [vmem:[%s1790_s16 + $0x78] sm:$0x3f] %v1217_v21  ;;  %v1282_v4 = vsel %vm813_vm1, %v1217_v21, 0.0  ;;  %v1326_v35 = vmul.f32 %v1217_v21, %v1217_v21  ;;  %v1059_v56 = vadd.f32 %v999_v1, %v900_v36  ;;  %v175_v14 = vmul.f32 %v2308_v51, %v2327_v62 }
  0x8e   : > { %v1283_v41 = vadd.f32 %v1282_v4, %v1281_v16  ;;  %v263_v11 = vadd.f32 %v235_v53, %v202_v3  ;;  %v236_v59 = vmul.f32 %v2320_v39, %v2438_v34  ;;  %v297_v38 = vmul.f32 %v2343_v31, %v2223_v15 }
  0x8f   : > { %v1360_v63 = vsel %vm813_vm1, %v1326_v35, 0.0  ;;  %v1218_v28 = vadd.f32 %v1158_v13, %v1059_v56  ;;  %v2456_v30 = vmul.f32 %v2343_v31, %v2225_v18  ;;  %v203_v19 = vadd.f32 %v175_v14, %v114_v6  ;;  %v51_v56 = vld [vmem:[%s1653_s23 + $0xc0] sm:$0xff] }
  0x90   : > { %v1361_v23 = vadd.f32 %v1360_v63, %v1359_v22  ;;  %v423_v16 = vadd.f32 %v361_v43, %v263_v11  ;;  %v363_v32 = vrot.slane %v297_v38, 1  ;;  %v457_v58 = vmul.f32 %v2354_v48, %v2327_v62 }
  0x91   : > { %v2462_v54 = vmul.f32 %v2354_v48, %v2329_v61  ;;  %1248 = vst [vmem:[%s1790_s16 + $0x80] sm:$0xff] %v1218_v28  ;;  %v1284_v55 = vadd.f32 %v1283_v41, %v1218_v28  ;;  %v1327_v37 = vmul.f32 %v1218_v28, %v1218_v28  ;;  %v364_v22 = vrot.slane %v2456_v30, 1 }
  0x92   : > { %v582_v44 = vadd.f32 %v520_v12, %v423_v16  ;;  %v264_v43 = vadd.f32 %v236_v59, %v203_v19  ;;  %v522_v29 = vrot.slane %v457_v58, 1  ;;  %v616_v10 = vmul.f32 %v2370_v0, %v2438_v34  ;;  %v52_v58 = vld [vmem:[%s1653_s23 + $0xc8] sm:$0xff] }
  0x93   : > { %v523_v20 = vrot.slane %v2462_v54, 1  ;;  %v1362_v50 = vadd.f32 %v1361_v23, %v1327_v37  ;;  %v365_v46 = vsel %vm335_vm0, %v363_v32, %v364_v22  ;;  %v2472_v49 = vmul.f32 %v2370_v0, %v2443_v9 }
  0x94   : > { %v741_v17 = vadd.f32 %v679_v40, %v582_v44  ;;  %v424_v45 = vadd.f32 %v365_v46, %v264_v43  ;;  %v681_v52 = vrot.slane %v616_v10, 1  ;;  %v775_v47 = vmul.f32 %v2384_v25, %v2223_v15 }
  0x95   : > { %v524_v12 = vsel %vm335_vm0, %v522_v29, %v523_v20  ;;  %v682_v26 = vrot.slane %v2472_v49, 1  ;;  %v2480_v40 = vmul.f32 %v2384_v25, %v2225_v18  ;;  %v935_v33 = vmul.f32 %v2396_v5, %v2327_v62 }
  0x96   : > { %v901_v7 = vadd.f32 %v839_v60, %v741_v17  ;;  %v583_v21 = vadd.f32 %v524_v12, %v424_v45  ;;  %v841_v1 = vrot.slane %v775_v47, 2  ;;  %v2486_v27 = vmul.f32 %v2396_v5, %v2329_v61 }
  0x97   : > { %v1094_v15 = vmul.f32 %v2415_v57, %v2438_v34  ;;  %v683_v36 = vsel %vm335_vm0, %v681_v52, %v682_v26  ;;  %v842_v3 = vrot.slane %v2480_v40, 2  ;;  %v1000_v53 = vrot.slane %v935_v33, 2 }
  0x98   : > { %v1060_v60 = vadd.f32 %v998_v42, %v901_v7  ;;  %v742_v4 = vadd.f32 %v683_v36, %v583_v21  ;;  %v1001_v35 = vrot.slane %v2486_v27, 2  ;;  %v2497_v13 = vmul.f32 %v2415_v57, %v2443_v9 }
  0x99   : > { %v1159_v41 = vrot.slane %v1094_v15, 2  ;;  %v843_v6 = vsel %vm813_vm1, %v841_v1, %v842_v3  ;;  %v115_v24 = vmul.f32 %v2301_v8, %v2225_v18  ;;  %v176_v42 = vmul.f32 %v2308_v51, %v2329_v61 }
  0x9a   : > { %v1219_v11 = vadd.f32 %v1157_v2, %v1060_v60  ;;  %v902_v63 = vadd.f32 %v843_v6, %v742_v4  ;;  %v1002_v14 = vsel %vm813_vm1, %v1000_v53, %v1001_v35  ;;  %v1160_v59 = vrot.slane %v2497_v13, 2 }
  0x9b   : > { %v237_v38 = vmul.f32 %v2320_v39, %v2443_v9  ;;  %v204_v28 = vadd.f32 %v176_v42, %v115_v24  ;;  %v2511_v16 = vmax.f32 %v51_v56, 0.0  ;;  %v116_v54 = vmul.f32 %v2301_v8, %v2327_v62 }
  0x9c   : > { %1249 = vst [vmem:[%s1790_s16 + $0x88] sm:$0x3f] %v1219_v11  ;;  %v1285_v2 = vsel %vm813_vm1, %v1219_v11, 0.0  ;;  %v1328_v23 = vmul.f32 %v1219_v11, %v1219_v11  ;;  %v1061_v30 = vadd.f32 %v1002_v14, %v902_v63  ;;  %v1161_v18 = vsel %vm813_vm1, %v1159_v41, %v1160_v59 }
  0x9d   : > { %v265_v32 = vadd.f32 %v237_v38, %v204_v28  ;;  %v177_v37 = vmul.f32 %v2308_v51, %v2438_v34  ;;  %v1286_v44 = vadd.f32 %v1285_v2, %v1284_v55  ;;  %v238_v29 = vmul.f32 %v2320_v39, %v2511_v16 }
  0x9e   : > { %v1363_v19 = vsel %vm813_vm1, %v1328_v23, 0.0  ;;  %v1220_v43 = vadd.f32 %v1161_v18, %v1061_v30  ;;  %v299_v10 = vmul.f32 %v2343_v31, %v2327_v62  ;;  %v2526_v49 = vmul.f32 %v2343_v31, %v2329_v61  ;;  %v53_v23 = vld [vmem:[%s1653_s23 + $0xd0] sm:$0xff] }
  0x9f   : > { %v425_v17 = vadd.f32 %v364_v22, %v265_v32  ;;  %v205_v46 = vadd.f32 %v177_v37, %v116_v54  ;;  %v459_v45 = vmul.f32 %v2354_v48, %v2438_v34  ;;  %v1364_v12 = vadd.f32 %v1363_v19, %v1362_v50 }
  0xa0   : > { %1250 = vst [vmem:[%s1790_s16 + $0x90] sm:$0xff] %v1220_v43  ;;  %v2531_v52 = vmax.f32 %v52_v58, 0.0  ;;  %v366_v55 = vrot.slane %v299_v10, 1  ;;  %v2535_v47 = vmul.f32 %v2354_v48, %v2443_v9  ;;  %v367_v22 = vrot.slane %v2526_v49, 1 }
  0xa1   : > { %v584_v7 = vadd.f32 %v523_v20, %v425_v17  ;;  %v266_v40 = vadd.f32 %v238_v29, %v205_v46  ;;  %v525_v33 = vrot.slane %v459_v45, 1  ;;  %v1329_v21 = vmul.f32 %v1220_v43, %v1220_v43  ;;  %v54_v45 = vld [vmem:[%s1653_s23 + $0xd8] sm:$0xff] }
  0xa2   : > { %v526_v1 = vrot.slane %v2535_v47, 1  ;;  %v618_v27 = vmul.f32 %v2370_v0, %v2511_v16  ;;  %v2543_v50 = vmul.f32 %v2370_v0, %v2531_v52  ;;  %v368_v60 = vsel %vm335_vm0, %v366_v55, %v367_v22 }
  0xa3   : > { %v743_v15 = vadd.f32 %v682_v26, %v584_v7  ;;  %v777_v20 = vmul.f32 %v2384_v25, %v2327_v62  ;;  %v2550_v36 = vmul.f32 %v2384_v25, %v2329_v61  ;;  %v426_v53 = vadd.f32 %v368_v60, %v266_v40 }
  0xa4   : > { %v527_v4 = vsel %vm335_vm0, %v525_v33, %v526_v1  ;;  %v684_v13 = vrot.slane %v618_v27, 1  ;;  %v685_v41 = vrot.slane %v2543_v50, 1  ;;  %v937_v62 = vmul.f32 %v2396_v5, %v2438_v34 }
  0xa5   : > { %v903_v56 = vadd.f32 %v842_v3, %v743_v15  ;;  %v844_v26 = vrot.slane %v777_v20, 2  ;;  %v845_v11 = vrot.slane %v2550_v36, 2  ;;  %v585_v6 = vadd.f32 %v527_v4, %v426_v53 }
  0xa6   : > { %v686_v24 = vsel %vm335_vm0, %v684_v13, %v685_v41  ;;  %v2562_v42 = vmul.f32 %v2396_v5, %v2443_v9  ;;  %v1096_v63 = vmul.f32 %v2415_v57, %v2511_v16  ;;  %v1003_v38 = vrot.slane %v937_v62, 2 }
  0xa7   : > { %v1062_v14 = vadd.f32 %v1001_v35, %v903_v56  ;;  %v846_v3 = vsel %vm813_vm1, %v844_v26, %v845_v11  ;;  %v2571_v2 = vmul.f32 %v2415_v57, %v2531_v52  ;;  %v744_v28 = vadd.f32 %v686_v24, %v585_v6 }
  0xa8   : > { %v1004_v30 = vrot.slane %v2562_v42, 2  ;;  %v1162_v18 = vrot.slane %v1096_v63, 2  ;;  %v117_v19 = vmul.f32 %v2301_v8, %v2329_v61  ;;  %v178_v58 = vmul.f32 %v2308_v51, %v2443_v9 }
  0xa9   : > { %v1221_v35 = vadd.f32 %v1160_v59, %v1062_v14  ;;  %v1163_v32 = vrot.slane %v2571_v2, 2  ;;  %v239_v54 = vmul.f32 %v2320_v39, %v2531_v52  ;;  %v1287_v37 = vadd.f32 %v1286_v44, %v1220_v43  ;;  %v56_v2 = vld [vmem:[%s1653_s23 + $0xe8] sm:$0xff] }
  0xaa   : > { %v904_v29 = vadd.f32 %v846_v3, %v744_v28  ;;  %v1005_v10 = vsel %vm813_vm1, %v1003_v38, %v1004_v30  ;;  %v2583_v17 = vmax.f32 %v53_v23, 0.0  ;;  %v1365_v46 = vadd.f32 %v1364_v12, %v1329_v21 }
  0xab   : > { %1251 = vst [vmem:[%s1790_s16 + $0x98] sm:$0x3f] %v1221_v35  ;;  %v1330_v49 = vmul.f32 %v1221_v35, %v1221_v35  ;;  %v1164_v61 = vsel %vm813_vm1, %v1162_v18, %v1163_v32  ;;  %v206_v59 = vadd.f32 %v178_v58, %v117_v19  ;;  %v1288_v55 = vsel %vm813_vm1, %v1221_v35, 0.0 }
  0xac   : > { %v1063_v7 = vadd.f32 %v1005_v10, %v904_v29  ;;  %v118_v44 = vmul.f32 %v2301_v8, %v2438_v34  ;;  %v179_v43 = vmul.f32 %v2308_v51, %v2511_v16  ;;  %v240_v33 = vmul.f32 %v2320_v39, %v2583_v17 }
  0xad   : > { %v1366_v12 = vsel %vm813_vm1, %v1330_v49, 0.0  ;;  %v267_v40 = vadd.f32 %v239_v54, %v206_v59  ;;  %v301_v21 = vmul.f32 %v2343_v31, %v2438_v34  ;;  %v2600_v50 = vmax.f32 %v54_v45, 0.0 }
  0xae   : > { %v1222_v27 = vadd.f32 %v1164_v61, %v1063_v7  ;;  %v207_v15 = vadd.f32 %v179_v43, %v118_v44  ;;  %v2604_v60 = vmul.f32 %v2343_v31, %v2443_v9  ;;  %v461_v4 = vmul.f32 %v2354_v48, %v2511_v16 }
  0xaf   : > { %v427_v20 = vadd.f32 %v367_v22, %v267_v40  ;;  %v369_v53 = vrot.slane %v301_v21, 1  ;;  %v2610_v13 = vmul.f32 %v2354_v48, %v2531_v52  ;;  %v1289_v56 = vadd.f32 %v1288_v55, %v1287_v37  ;;  %v55_v55 = vld [vmem:[%s1653_s23 + $0xe0] sm:$0xff] }
  0xb0   : > { %v1367_v26 = vadd.f32 %v1366_v12, %v1365_v46  ;;  %1252 = vst [vmem:[%s1790_s16 + $0xa0] sm:$0xff] %v1222_v27  ;;  %v268_v62 = vadd.f32 %v240_v33, %v207_v15  ;;  %v370_v6 = vrot.slane %v2604_v60, 1  ;;  %v528_v42 = vrot.slane %v461_v4, 1 }
  0xb1   : > { %v586_v24 = vadd.f32 %v526_v1, %v427_v20  ;;  %v529_v22 = vrot.slane %v2610_v13, 1  ;;  %v620_v63 = vmul.f32 %v2370_v0, %v2583_v17  ;;  %v1331_v14 = vmul.f32 %v1222_v27, %v1222_v27 }
  0xb2   : > { %v371_v3 = vsel %vm335_vm0, %v369_v53, %v370_v6  ;;  %v2622_v38 = vmul.f32 %v2370_v0, %v2600_v50  ;;  %v779_v23 = vmul.f32 %v2384_v25, %v2438_v34  ;;  %v2630_v35 = vmul.f32 %v2384_v25, %v2443_v9 }
  0xb3   : > { %v745_v28 = vadd.f32 %v685_v41, %v586_v24  ;;  %v428_v18 = vadd.f32 %v371_v3, %v268_v62  ;;  %v530_v47 = vsel %vm335_vm0, %v528_v42, %v529_v22  ;;  %v687_v1 = vrot.slane %v620_v63, 1 }
  0xb4   : > { %v688_v19 = vrot.slane %v2622_v38, 1  ;;  %v847_v58 = vrot.slane %v779_v23, 2  ;;  %v939_v54 = vmul.f32 %v2396_v5, %v2511_v16  ;;  %v2638_v41 = vmul.f32 %v2396_v5, %v2531_v52 }
  0xb5   : > { %v905_v37 = vadd.f32 %v845_v11, %v745_v28  ;;  %v587_v34 = vadd.f32 %v530_v47, %v428_v18  ;;  %v1098_v29 = vmul.f32 %v2415_v57, %v2583_v17  ;;  %v848_v46 = vrot.slane %v2630_v35, 2 }
  0xb6   : > { %v689_v10 = vsel %vm335_vm0, %v687_v1, %v688_v19  ;;  %v1006_v49 = vrot.slane %v939_v54, 2  ;;  %v2646_v61 = vmul.f32 %v2415_v57, %v2600_v50  ;;  %v1007_v11 = vrot.slane %v2638_v41, 2 }
  0xb7   : > { %v1064_v59 = vadd.f32 %v1004_v30, %v905_v37  ;;  %v746_v36 = vadd.f32 %v689_v10, %v587_v34  ;;  %v1165_v45 = vrot.slane %v1098_v29, 2  ;;  %v849_v7 = vsel %vm813_vm1, %v847_v58, %v848_v46 }
  0xb8   : > { %v1166_v44 = vrot.slane %v2646_v61, 2  ;;  %v119_v43 = vmul.f32 %v2301_v8, %v2443_v9  ;;  %v180_v12 = vmul.f32 %v2308_v51, %v2531_v52  ;;  %v1008_v33 = vsel %vm813_vm1, %v1006_v49, %v1007_v11 }
  0xb9   : > { %v1223_v30 = vadd.f32 %v1163_v32, %v1064_v59  ;;  %v906_v40 = vadd.f32 %v849_v7, %v746_v36  ;;  %v241_v21 = vmul.f32 %v2320_v39, %v2600_v50  ;;  %v1290_v15 = vadd.f32 %v1289_v56, %v1222_v27 }
  0xba   : > { %v1167_v60 = vsel %vm813_vm1, %v1165_v45, %v1166_v44  ;;  %v208_v20 = vadd.f32 %v180_v12, %v119_v43  ;;  %v2664_v53 = vmax.f32 %v55_v55, 0.0  ;;  %v1368_v9 = vadd.f32 %v1367_v26, %v1331_v14 }
  0xbb   : > { %1253 = vst [vmem:[%s1790_s16 + $0xa8] sm:$0x3f] %v1223_v30  ;;  %v1332_v4 = vmul.f32 %v1223_v30, %v1223_v30  ;;  %v1065_v13 = vadd.f32 %v1008_v33, %v906_v40  ;;  %v120_v32 = vmul.f32 %v2301_v8, %v2511_v16  ;;  %v1291_v62 = vsel %vm813_vm1, %v1223_v30, 0.0 }
  0xbc   : > { %v269_v24 = vadd.f32 %v241_v21, %v208_v20  ;;  %v181_v27 = vmul.f32 %v2308_v51, %v2583_v17  ;;  %v242_v56 = vmul.f32 %v2320_v39, %v2664_v53  ;;  %v303_v63 = vmul.f32 %v2343_v31, %v2511_v16 }
  0xbd   : > { %v1369_v42 = vsel %vm813_vm1, %v1332_v4, 0.0  ;;  %v1224_v26 = vadd.f32 %v1167_v60, %v1065_v13  ;;  %v2680_v14 = vmul.f32 %v2343_v31, %v2531_v52  ;;  %v2682_v38 = vmax.f32 %v56_v2, 0.0  ;;  %v57_v4 = vld [vmem:[%s1653_s23 + $0xf0] sm:$0xff] }
  0xbe   : > { %v429_v3 = vadd.f32 %v370_v6, %v269_v24  ;;  %v209_v23 = vadd.f32 %v181_v27, %v120_v32  ;;  %v463_v28 = vmul.f32 %v2354_v48, %v2583_v17  ;;  %v1292_v18 = vadd.f32 %v1291_v62, %v1290_v15 }
  0xbf   : > { %v1370_v47 = vadd.f32 %v1369_v42, %v1368_v9  ;;  %1254 = vst [vmem:[%s1790_s16 + $0xb0] sm:$0xff] %v1224_v26  ;;  %v372_v1 = vrot.slane %v303_v63, 1  ;;  %v373_v35 = vrot.slane %v2680_v14, 1  ;;  %v464_v37 = vmul.f32 %v2354_v48, %v2600_v50 }
  0xc0   : > { %v588_v58 = vadd.f32 %v529_v22, %v429_v3  ;;  %v270_v54 = vadd.f32 %v242_v56, %v209_v23  ;;  %v531_v34 = vrot.slane %v463_v28, 1  ;;  %v1333_v41 = vmul.f32 %v1224_v26, %v1224_v26 }
  0xc1   : > { %v374_v6 = vsel %vm335_vm0, %v372_v1, %v373_v35  ;;  %v622_v29 = vmul.f32 %v2370_v0, %v2664_v53  ;;  %v2695_v10 = vmul.f32 %v2370_v0, %v2682_v38  ;;  %v532_v36 = vrot.slane %v464_v37, 1  ;;  %v58_v1 = vld [vmem:[%s1653_s23 + $0xf8] sm:$0xff] }
  0xc2   : > { %v747_v49 = vadd.f32 %v688_v19, %v588_v58  ;;  %v430_v59 = vadd.f32 %v374_v6, %v270_v54  ;;  %v781_v22 = vmul.f32 %v2384_v25, %v2511_v16  ;;  %v2702_v7 = vmul.f32 %v2384_v25, %v2531_v52 }
  0xc3   : > { %v690_v45 = vrot.slane %v622_v29, 1  ;;  %v691_v55 = vrot.slane %v2695_v10, 1  ;;  %v941_v43 = vmul.f32 %v2396_v5, %v2583_v17  ;;  %v533_v30 = vsel %vm335_vm0, %v531_v34, %v532_v36 }
  0xc4   : > { %v907_v12 = vadd.f32 %v848_v46, %v747_v49  ;;  %v850_v19 = vrot.slane %v781_v22, 2  ;;  %v2709_v40 = vmul.f32 %v2396_v5, %v2600_v50  ;;  %v589_v16 = vadd.f32 %v533_v30, %v430_v59 }
  0xc5   : > { %v692_v33 = vsel %vm335_vm0, %v690_v45, %v691_v55  ;;  %v851_v21 = vrot.slane %v2702_v7, 2  ;;  %v1009_v15 = vrot.slane %v941_v43, 2  ;;  %v1100_v46 = vmul.f32 %v2415_v57, %v2664_v53 }
  0xc6   : > { %v1066_v60 = vadd.f32 %v1007_v11, %v907_v12  ;;  %v1010_v20 = vrot.slane %v2709_v40, 2  ;;  %v2718_v9 = vmul.f32 %v2415_v57, %v2682_v38  ;;  %v748_v13 = vadd.f32 %v692_v33, %v589_v16 }
  0xc7   : > { %v852_v2 = vsel %vm813_vm1, %v850_v19, %v851_v21  ;;  %v121_v32 = vmul.f32 %v2301_v8, %v2531_v52  ;;  %v182_v11 = vmul.f32 %v2308_v51, %v2600_v50  ;;  %v1168_v27 = vrot.slane %v1100_v46, 2 }
  0xc8   : > { %v1225_v62 = vadd.f32 %v1166_v44, %v1066_v60  ;;  %v1011_v24 = vsel %vm813_vm1, %v1009_v15, %v1010_v20  ;;  %v1169_v56 = vrot.slane %v2718_v9, 2  ;;  %v908_v42 = vadd.f32 %v852_v2, %v748_v13 }
  0xc9   : > { %v210_v63 = vadd.f32 %v182_v11, %v121_v32  ;;  %v243_v14 = vmul.f32 %v2320_v39, %v2682_v38  ;;  %v89_v3 = vmax.f32 %v57_v4, 0.0  ;;  %v122_v61 = vmul.f32 %v2301_v8, %v2583_v17 }
  0xca   : > { %1255 = vst [vmem:[%s1790_s16 + $0xb8] sm:$0x3f] %v1225_v62  ;;  %v1170_v52 = vsel %vm813_vm1, %v1168_v27, %v1169_v56  ;;  %v1067_v23 = vadd.f32 %v1011_v24, %v908_v42  ;;  %v1293_v44 = vadd.f32 %v1292_v18, %v1224_v26  ;;  %v183_v58 = vmul.f32 %v2308_v51, %v2664_v53 }
  0xcb   : > { %v271_v28 = vadd.f32 %v243_v14, %v210_v63  ;;  %v244_v54 = vmul.f32 %v2320_v39, %v89_v3  ;;  %v305_v37 = vmul.f32 %v2343_v31, %v2583_v17  ;;  %v1371_v34 = vadd.f32 %v1370_v47, %v1333_v41 }
  0xcc   : > { %v1226_v6 = vadd.f32 %v1170_v52, %v1067_v23  ;;  %v306_v10 = vmul.f32 %v2343_v31, %v2600_v50  ;;  %v211_v49 = vadd.f32 %v183_v58, %v122_v61  ;;  %v465_v26 = vmul.f32 %v2354_v48, %v2664_v53 }
  0xcd   : > { %v431_v29 = vadd.f32 %v373_v35, %v271_v28  ;;  %v375_v59 = vrot.slane %v305_v37, 1  ;;  %v466_v18 = vmul.f32 %v2354_v48, %v2682_v38  ;;  %v1294_v22 = vsel %vm813_vm1, %v1225_v62, 0.0 }
  0xce   : > { %1256 = vst [vmem:[%s1790_s16 + $0xc0] sm:$0xff] %v1226_v6  ;;  %v90_v7 = vmax.f32 %v58_v1, 0.0  ;;  %v376_v43 = vrot.slane %v306_v10, 1  ;;  %v272_v47 = vadd.f32 %v244_v54, %v211_v49  ;;  %v534_v41 = vrot.slane %v465_v26, 1 }
  0xcf   : > { %v590_v45 = vadd.f32 %v532_v36, %v431_v29  ;;  %v535_v35 = vrot.slane %v466_v18, 1  ;;  %v624_v12 = vmul.f32 %v2370_v0, %v89_v3  ;;  %v1334_v31 = vmul.f32 %v1225_v62, %v1225_v62 }
  0xd0   : > { %v377_v19 = vsel %vm335_vm0, %v375_v59, %v376_v43  ;;  %v625_v40 = vmul.f32 %v2370_v0, %v90_v7  ;;  %v783_v36 = vmul.f32 %v2384_v25, %v2583_v17  ;;  %v784_v46 = vmul.f32 %v2384_v25, %v2600_v50 }
  0xd1   : > { %v749_v30 = vadd.f32 %v691_v55, %v590_v45  ;;  %v432_v16 = vadd.f32 %v377_v19, %v272_v47  ;;  %v536_v48 = vsel %vm335_vm0, %v534_v41, %v535_v35  ;;  %v693_v33 = vrot.slane %v624_v12, 1 }
  0xd2   : > { %v694_v60 = vrot.slane %v625_v40, 1  ;;  %v943_v9 = vmul.f32 %v2396_v5, %v2664_v53  ;;  %v853_v4 = vrot.slane %v783_v36, 2  ;;  %v944_v0 = vmul.f32 %v2396_v5, %v2682_v38  ;;  %v1260_v36 = vld [vmem:[#allocation2] sm:$0x1] }
  0xd3   : > { %v909_v15 = vadd.f32 %v851_v21, %v749_v30  ;;  %v591_v55 = vadd.f32 %v536_v48, %v432_v16  ;;  %v1102_v13 = vmul.f32 %v2415_v57, %v89_v3  ;;  %v854_v17 = vrot.slane %v784_v46, 2  ;;  %v1310_v46 = vld [vmem:[#allocation3] sm:$0x1] }
  0xd4   : > { %v695_v32 = vsel %vm335_vm0, %v693_v33, %v694_v60  ;;  %v1012_v21 = vrot.slane %v943_v9, 2  ;;  %v1013_v62 = vrot.slane %v944_v0, 2  ;;  %v1103_v25 = vmul.f32 %v2415_v57, %v90_v7 }
  0xd5   : > { %v1068_v2 = vadd.f32 %v1010_v20, %v909_v15  ;;  %v750_v11 = vadd.f32 %v695_v32, %v591_v55  ;;  %v1171_v24 = vrot.slane %v1102_v13, 2  ;;  %v855_v53 = vsel %vm813_vm1, %v853_v4, %v854_v17 }
  0xd6   : > { %v123_v42 = vmul.f32 %v2301_v8, %v2600_v50  ;;  %v184_v5 = vmul.f32 %v2308_v51, %v2682_v38  ;;  %v1014_v63 = vsel %vm813_vm1, %v1012_v21, %v1013_v62  ;;  %v1172_v14 = vrot.slane %v1103_v25, 2  ;;  %v1397_v25 = vld [vmem:[%s2935_s2] sm:$0x1] (%p21_p0) }
  0xd7   : > { %v1227_v27 = vadd.f32 %v1169_v56, %v1068_v2  ;;  %v910_v20 = vadd.f32 %v855_v53, %v750_v11  ;;  %v245_v3 = vmul.f32 %v2320_v39, %v90_v7  ;;  %v1372_v52 = vsel %vm813_vm1, %v1334_v31, 0.0  ;;  %v2792_v53 = vld [vmem:[%s2936_s3] sm:$0x1] (%p21_p0) }
  0xd8   : > { %v212_v57 = vadd.f32 %v184_v5, %v123_v42  ;;  %v1295_v56 = vadd.f32 %v1294_v22, %v1293_v44  ;;  %v1173_v28 = vsel %vm813_vm1, %v1171_v24, %v1172_v14  ;;  %v1373_v8 = vadd.f32 %v1372_v52, %v1371_v34 }
  0xd9   : > { %1257 = vst [vmem:[%s1790_s16 + $0xc8] sm:$0x3f] %v1227_v27  ;;  %v1069_v23 = vadd.f32 %v1014_v63, %v910_v20  ;;  %v1335_v50 = vmul.f32 %v1226_v6, %v1226_v6  ;;  %v1336_v51 = vmul.f32 %v1227_v27, %v1227_v27  ;;  %v1297_v54 = vsel %vm813_vm1, %v1227_v27, 0.0 }
  0xda   : > { %v273_v61 = vadd.f32 %v245_v3, %v212_v57  ;;  %v1296_v58 = vadd.f32 %v1295_v56, %v1226_v6 }
  0xdb   : > { %v1228_v1 = vadd.f32 %v1173_v28, %v1069_v23  ;;  %v1374_v37 = vadd.f32 %v1373_v8, %v1335_v50  ;;  %v1375_v29 = vsel %vm813_vm1, %v1336_v51, 0.0 }
  0xdc   : > { %v433_v38 = vadd.f32 %v376_v43, %v273_v61  ;;  %v1298_v44 = vadd.f32 %v1297_v54, %v1296_v58 }
  0xdd   : > { %1258 = vst [vmem:[%s1790_s16 + $0xd0] sm:$0xff] %v1228_v1  ;;  %v1376_v59 = vadd.f32 %v1375_v29, %v1374_v37  ;;  %v1337_v26 = vmul.f32 %v1228_v1, %v1228_v1 }
  0xde   : > { %v592_v39 = vadd.f32 %v535_v35, %v433_v38  ;;  %v1299_v34 = vadd.f32 %v1298_v44, %v1228_v1 }
  0xdf   : > { %v1377_v45 = vadd.f32 %v1376_v59, %v1337_v26 }
  0xe0   : > { %v751_v10 = vadd.f32 %v694_v60, %v592_v39 }
  0xe2   : > { %v911_v49 = vadd.f32 %v854_v17, %v751_v10 }
  0xe4   : > { %v1070_v18 = vadd.f32 %v1013_v62, %v911_v49 }
  0xe6   : > { %v1229_v22 = vadd.f32 %v1172_v14, %v1070_v18 }
  0xe8   : > { %1259 = vst [vmem:[%s1790_s16 + $0xd8] sm:$0x3f] %v1229_v22  ;;  %v1300_v7 = vsel %vm813_vm1, %v1229_v22, 0.0  ;;  %v1338_v6 = vmul.f32 %v1229_v22, %v1229_v22 }
  0xe9   : > { %v1301_v43 = vadd.f32 %v1300_v7, %v1299_v34 }
  0xea   : > { %v1378_v47 = vsel %vm813_vm1, %v1338_v6, 0.0 }
  0xeb   : > { %v1302_v41 = vrot.slane %v1301_v43, 4  ;;  %v1379_v35 = vadd.f32 %v1378_v47, %v1377_v45 }
  0xed   : > { %v1303_v12 = vadd.f32 %v1302_v41, %v1301_v43  ;;  %v1380_v31 = vrot.slane %v1379_v35, 4 }
  0xef   : > { %v1304_v30 = vrot.slane %v1303_v12, 2  ;;  %v1381_v19 = vadd.f32 %v1380_v31, %v1379_v35 }
  0xf1   : > { %v1305_v40 = vadd.f32 %v1304_v30, %v1303_v12  ;;  %v1382_v16 = vrot.slane %v1381_v19, 2 }
  0xf3   : > { %v1306_v48 = vrot.slane %v1305_v40, 1  ;;  %v1383_v33 = vadd.f32 %v1382_v16, %v1381_v19 }
  0xf5   : > { %v1307_v15 = vadd.f32 %v1306_v48, %v1305_v40  ;;  %v1384_v60 = vrot.slane %v1383_v33, 1 }
  0xf7   : > { %v1308_v9 = vadd.f32 %v1307_v15, %v1260_v36  ;;  %v1385_v55 = vadd.f32 %v1384_v60, %v1383_v33  ;;  %23 = sbr.rel (!%p21_p0) target bundleno = 2 (0x2), region = 53 }
  0xf9   : > { %1309 = vst [vmem:[#allocation2] sm:$0x1] %v1308_v9  ;;  %v1386_v4 = vadd.f32 %v1385_v55, %v1310_v46 }
  0xfb   : > { %1387 = vst [vmem:[#allocation3] sm:$0x1] %v1386_v4 }
 0x100   :  { %v1388_v0 = vld [vmem:[#allocation2] sm:$0x1] }
 0x101   :  { %v1389_v2 = vmul.f32 0.0025510204, %v1388_v0 }
 0x102   :  { %v1390_v13 = vld [vmem:[#allocation3] sm:$0x1] }
 0x103   :  { %v1391_v32 = vmul.f32 0.0025510204, %v1390_v13  ;;  %v1392_v17 = vmul.f32 %v1389_v2, %v1389_v2 }
 0x105   :  { %v1393_v21 = vsub.f32 %v1391_v32, %v1392_v17 }
 0x107   :  { %v1394_v11 = vmax.f32 %v1393_v21, 0.0 }
 0x109   :  { %v1395_v62 = vadd.f32 1e-05, %v1394_v11 }
 0x10b   :  { %1590 = vrsqrt.f32 %v1395_v62 }
 0x118   :  { %v1591_v24 = vpop.eup %1590 }
 0x119   :  { %v2787_v27 = vmul.f32 %v1591_v24, %v1397_v25 }
 0x11b   :  { %v2795_v42 = vmul.f32 %v2787_v27, %v1389_v2 }
 0x11d   :  { %v1401_v5 = vsub.f32 %v2792_v53, %v2795_v42 }
 0x11e LB: > { %v1439_v20 = vlaneseq  ;;  %s1408_s1 = smul.u32 224, %s1606_s0  ;;  %s1407_s0 = sadd.s32 1, %s1606_s0   ;;  %s1606_s0 = sphi %s2799_s0, %s1407_s0  }
 0x11f   : > { %p1404_p1 = scmp.ge.s32.totalorder %s1407_s0, 2  }
 0x120   : > { %v1440_v63 = vshrl.u32 %v1439_v20, 7  ;;  %s2808_s15 = scalar_lea.vmem %s2937_s4, %s1408_s1 }
 0x121   : > { %v1410_v3 = vld [vmem:[%s2808_s15] sm:$0xff]  ;;  %v1411_v52 = vld [vmem:[%s2808_s15 + $0x8] sm:$0x3f]  ;;  %v1412_v57 = vld [vmem:[%s2808_s15 + $0x10] sm:$0xff] }
 0x122   : > { %v1441_v14 = vsub.s32 0, %v1440_v63  ;;  %v1413_v28 = vld [vmem:[%s2808_s15 + $0x18] sm:$0x3f]  ;;  %v1414_v61 = vld [vmem:[%s2808_s15 + $0x20] sm:$0xff]  ;;  %v1415_v8 = vld [vmem:[%s2808_s15 + $0x28] sm:$0x3f] }
 0x123   : > { %v1416_v50 = vld [vmem:[%s2808_s15 + $0x30] sm:$0xff]  ;;  %v1417_v1 = vld [vmem:[%s2808_s15 + $0x38] sm:$0x3f]  ;;  %v1418_v39 = vld [vmem:[%s2808_s15 + $0x40] sm:$0xff] }
 0x124   : > { %v2814_v56 = vrot.slane %v2787_v27, %v1441_v14  ;;  %v2819_v23 = vrot.slane %v1401_v5, %v1441_v14  ;;  %v1419_v37 = vld [vmem:[%s2808_s15 + $0x48] sm:$0x3f]  ;;  %v1420_v59 = vld [vmem:[%s2808_s15 + $0x50] sm:$0xff]  ;;  %v1421_v26 = vld [vmem:[%s2808_s15 + $0x58] sm:$0x3f] }
 0x125   : > { %v1422_v18 = vld [vmem:[%s2808_s15 + $0x60] sm:$0xff]  ;;  %v1423_v6 = vld [vmem:[%s2808_s15 + $0x68] sm:$0x3f]  ;;  %v1424_v43 = vld [vmem:[%s2808_s15 + $0x70] sm:$0xff] }
 0x126   : > { %v1444_v51 = vmul.f32 %v2814_v56, %v1410_v3  ;;  %v1445_v38 = vmul.f32 %v2814_v56, %v1411_v52  ;;  %v1446_v58 = vmul.f32 %v2814_v56, %v1412_v57  ;;  %v1447_v54 = vmul.f32 %v2814_v56, %v1413_v28  ;;  %v1425_v47 = vld [vmem:[%s2808_s15 + $0x78] sm:$0x3f]  ;;  %v1426_v48 = vld [vmem:[%s2808_s15 + $0x80] sm:$0xff]  ;;  %v1427_v33 = vld [vmem:[%s2808_s15 + $0x88] sm:$0x3f] }
 0x127   : > { %v1448_v29 = vmul.f32 %v2814_v56, %v1414_v61  ;;  %v1449_v10 = vmul.f32 %v2814_v56, %v1415_v8  ;;  %v1450_v44 = vmul.f32 %v2814_v56, %v1416_v50  ;;  %v1451_v49 = vmul.f32 %v2814_v56, %v1417_v1  ;;  %v1428_v9 = vld [vmem:[%s2808_s15 + $0x90] sm:$0xff]  ;;  %v1429_v55 = vld [vmem:[%s2808_s15 + $0x98] sm:$0x3f]  ;;  %v1430_v4 = vld [vmem:[%s2808_s15 + $0xa0] sm:$0xff] }
 0x128   : > { %v1478_v34 = vadd.f32 %v2819_v23, %v1444_v51  ;;  %v1479_v22 = vadd.f32 %v2819_v23, %v1445_v38  ;;  %v1480_v45 = vadd.f32 %v2819_v23, %v1446_v58  ;;  %v1481_v7 = vadd.f32 %v2819_v23, %v1447_v54  ;;  %v1431_v17 = vld [vmem:[%s2808_s15 + $0xa8] sm:$0x3f]  ;;  %v1432_v21 = vld [vmem:[%s2808_s15 + $0xb0] sm:$0xff]  ;;  %v1433_v11 = vld [vmem:[%s2808_s15 + $0xb8] sm:$0x3f] }
 0x129   : > { %v1482_v41 = vadd.f32 %v2819_v23, %v1448_v29  ;;  %v1483_v35 = vadd.f32 %v2819_v23, %v1449_v10  ;;  %v1484_v12 = vadd.f32 %v2819_v23, %v1450_v44  ;;  %v1485_v31 = vadd.f32 %v2819_v23, %v1451_v49  ;;  %v1434_v57 = vld [vmem:[%s2808_s15 + $0xc0] sm:$0xff]  ;;  %v1435_v1 = vld [vmem:[%s2808_s15 + $0xc8] sm:$0x3f]  ;;  %v1436_v51 = vld [vmem:[%s2808_s15 + $0xd0] sm:$0xff] }
 0x12a   : > { %1506 = vst [vmem:[%s2808_s15] sm:$0xff] %v1478_v34  ;;  %1507 = vst [vmem:[%s2808_s15 + $0x8] sm:$0x3f] %v1479_v22  ;;  %v1452_v30 = vmul.f32 %v2814_v56, %v1418_v39  ;;  %v1453_v19 = vmul.f32 %v2814_v56, %v1419_v37  ;;  %v1454_v40 = vmul.f32 %v2814_v56, %v1420_v59  ;;  %v1437_v38 = vld [vmem:[%s2808_s15 + $0xd8] sm:$0x3f] }
 0x12b   : > { %1508 = vst [vmem:[%s2808_s15 + $0x10] sm:$0xff] %v1480_v45  ;;  %1509 = vst [vmem:[%s2808_s15 + $0x18] sm:$0x3f] %v1481_v7  ;;  %v1455_v16 = vmul.f32 %v2814_v56, %v1421_v26  ;;  %v1456_v36 = vmul.f32 %v2814_v56, %v1422_v18  ;;  %v1457_v15 = vmul.f32 %v2814_v56, %v1423_v6 }
 0x12c   : > { %1510 = vst [vmem:[%s2808_s15 + $0x20] sm:$0xff] %v1482_v41  ;;  %1511 = vst [vmem:[%s2808_s15 + $0x28] sm:$0x3f] %v1483_v35  ;;  %v1458_v60 = vmul.f32 %v2814_v56, %v1424_v43  ;;  %v1459_v46 = vmul.f32 %v2814_v56, %v1425_v47  ;;  %v1486_v0 = vadd.f32 %v2819_v23, %v1452_v30 }
 0x12d   : > { %1512 = vst [vmem:[%s2808_s15 + $0x30] sm:$0xff] %v1484_v12  ;;  %1513 = vst [vmem:[%s2808_s15 + $0x38] sm:$0x3f] %v1485_v31  ;;  %v1487_v13 = vadd.f32 %v2819_v23, %v1453_v19  ;;  %v1488_v2 = vadd.f32 %v2819_v23, %v1454_v40  ;;  %v1489_v32 = vadd.f32 %v2819_v23, %v1455_v16 }
 0x12e   : > { %v1490_v62 = vadd.f32 %v2819_v23, %v1456_v36  ;;  %v1491_v25 = vadd.f32 %v2819_v23, %v1457_v15  ;;  %v1492_v24 = vadd.f32 %v2819_v23, %v1458_v60  ;;  %v1493_v20 = vadd.f32 %v2819_v23, %v1459_v46  ;;  %1514 = vst [vmem:[%s2808_s15 + $0x40] sm:$0xff] %v1486_v0 }
 0x12f   : > { %1515 = vst [vmem:[%s2808_s15 + $0x48] sm:$0x3f] %v1487_v13  ;;  %1516 = vst [vmem:[%s2808_s15 + $0x50] sm:$0xff] %v1488_v2  ;;  %v1460_v63 = vmul.f32 %v2814_v56, %v1426_v48  ;;  %v1461_v14 = vmul.f32 %v2814_v56, %v1427_v33  ;;  %v1462_v3 = vmul.f32 %v2814_v56, %v1428_v9 }
 0x130   : > { %1517 = vst [vmem:[%s2808_s15 + $0x58] sm:$0x3f] %v1489_v32  ;;  %v1463_v52 = vmul.f32 %v2814_v56, %v1429_v55  ;;  %1518 = vst [vmem:[%s2808_s15 + $0x60] sm:$0xff] %v1490_v62  ;;  %v1464_v28 = vmul.f32 %v2814_v56, %v1430_v4  ;;  %v1465_v61 = vmul.f32 %v2814_v56, %v1431_v17 }
 0x131   : > { %1519 = vst [vmem:[%s2808_s15 + $0x68] sm:$0x3f] %v1491_v25  ;;  %1520 = vst [vmem:[%s2808_s15 + $0x70] sm:$0xff] %v1492_v24  ;;  %v1466_v8 = vmul.f32 %v2814_v56, %v1432_v21  ;;  %v1467_v50 = vmul.f32 %v2814_v56, %v1433_v11  ;;  %v1494_v58 = vadd.f32 %v2819_v23, %v1460_v63 }
 0x132   : > { %1521 = vst [vmem:[%s2808_s15 + $0x78] sm:$0x3f] %v1493_v20  ;;  %v1495_v54 = vadd.f32 %v2819_v23, %v1461_v14  ;;  %v1496_v39 = vadd.f32 %v2819_v23, %v1462_v3  ;;  %v1497_v37 = vadd.f32 %v2819_v23, %v1463_v52  ;;  %v1498_v29 = vadd.f32 %v2819_v23, %v1464_v28 }
 0x133   : > { %v1499_v10 = vadd.f32 %v2819_v23, %v1465_v61  ;;  %v1500_v44 = vadd.f32 %v2819_v23, %v1466_v8  ;;  %v1501_v49 = vadd.f32 %v2819_v23, %v1467_v50  ;;  %1522 = vst [vmem:[%s2808_s15 + $0x80] sm:$0xff] %v1494_v58  ;;  %v1468_v59 = vmul.f32 %v2814_v56, %v1434_v57 }
 0x134   : > { %1523 = vst [vmem:[%s2808_s15 + $0x88] sm:$0x3f] %v1495_v54  ;;  %1524 = vst [vmem:[%s2808_s15 + $0x90] sm:$0xff] %v1496_v39  ;;  %v1469_v26 = vmul.f32 %v2814_v56, %v1435_v1  ;;  %v1470_v18 = vmul.f32 %v2814_v56, %v1436_v51  ;;  %v1471_v34 = vmul.f32 %v2814_v56, %v1437_v38 }
 0x135   : > { %1525 = vst [vmem:[%s2808_s15 + $0x98] sm:$0x3f] %v1497_v37  ;;  %1526 = vst [vmem:[%s2808_s15 + $0xa0] sm:$0xff] %v1498_v29  ;;  %v1502_v22 = vadd.f32 %v2819_v23, %v1468_v59  ;;  %1406 = sbr.rel (!%p1404_p1) target bundleno = 286 (0x11e), region = 64 }
 0x136   : > { %1527 = vst [vmem:[%s2808_s15 + $0xa8] sm:$0x3f] %v1499_v10  ;;  %1528 = vst [vmem:[%s2808_s15 + $0xb0] sm:$0xff] %v1500_v44  ;;  %v1503_v45 = vadd.f32 %v2819_v23, %v1469_v26  ;;  %v1504_v7 = vadd.f32 %v2819_v23, %v1470_v18  ;;  %v1505_v6 = vadd.f32 %v2819_v23, %v1471_v34 }
 0x137   : > { %1529 = vst [vmem:[%s2808_s15 + $0xb8] sm:$0x3f] %v1501_v49  ;;  %1530 = vst [vmem:[%s2808_s15 + $0xc0] sm:$0xff] %v1502_v22 }
 0x138   : > { %1531 = vst [vmem:[%s2808_s15 + $0xc8] sm:$0x3f] %v1503_v45  ;;  %1532 = vst [vmem:[%s2808_s15 + $0xd0] sm:$0xff] %v1504_v7 }
 0x139   : > { %1533 = vst [vmem:[%s2808_s15 + $0xd8] sm:$0x3f] %v1505_v6 }

</bundles_post_ra>
